<compile_context>
chip_gen: v6e
topology: v6e:2x2x1
jax: 0.10.0
libtpu: 0.0.40
codegen_flags: <defaults>
</compile_context>

<pallas_src>
import jax
import jax.numpy as jnp
from jax import lax
from jax.experimental import pallas as pl
from jax.experimental.pallas import tpu as pltpu

TB = 256  # triples scored per grid step (lane-dense; amortizes ~600-cycle step overhead)


def _score_kernel(h_ids_ref, t_ids_ref,   # VMEM blocks: (1, TB) int32 graph entity ids
                  embT_ref, rel_ref,      # VMEM resident: (D, E) transposed table, (D, 1) relation col
                  out_ref):               # VMEM block:  (1, TB) f32 per-triple -score_hrt
    num_e = embT_ref.shape[1]
    tb = h_ids_ref.shape[1]

    h_ids = h_ids_ref[...]                                   # (1, TB)
    t_ids = t_ids_ref[...]                                   # (1, TB)
    emb_t = embT_ref[...]                                    # (D, E)

    # Vectorized gather via one-hot matmul on the MXU (no per-row masked stores,
    # no dynamic indexing).  HIGHEST precision keeps the f32 gather exact.
    eids = lax.broadcasted_iota(jnp.int32, (num_e, tb), 0)   # (E, TB)
    onehot_h = (eids == h_ids).astype(jnp.float32)           # (E, TB)
    onehot_t = (eids == t_ids).astype(jnp.float32)           # (E, TB)
    h_t = jnp.dot(emb_t, onehot_h, preferred_element_type=jnp.float32,
                  precision=lax.Precision.HIGHEST)           # (D, TB)
    t_t = jnp.dot(emb_t, onehot_t, preferred_element_type=jnp.float32,
                  precision=lax.Precision.HIGHEST)           # (D, TB)

    # TransE interaction: score_hrt = -||h + r - t||_2 ; module returns -score_hrt.
    diff = h_t + rel_ref[...] - t_t                          # (D, TB), rel broadcasts over lanes
    dist2 = jnp.sum(diff * diff, axis=0, keepdims=True)      # (1, TB) sublane reduction
    out_ref[...] = jnp.sqrt(dist2)                           # lane-dense store


@jax.jit
def _score_triples_pallas(h_ids, t_ids, emb_t, rel_col):
    # h_ids / t_ids: (n_blocks, 1, TB) int32 ;  emb_t: (D, E) ;  rel_col: (D, 1)
    n_blocks, _, tb = h_ids.shape
    return pl.pallas_call(
        _score_kernel,
        out_shape=jax.ShapeDtypeStruct((n_blocks, 1, tb), jnp.float32),
        grid=(n_blocks,),
        in_specs=[
            pl.BlockSpec((None, 1, tb), lambda i: (i, 0, 0)),
            pl.BlockSpec((None, 1, tb), lambda i: (i, 0, 0)),
            # constant inputs: fully resident in VMEM, single-buffered (no pipelining)
            pl.BlockSpec(memory_space=pltpu.MemorySpace.VMEM),
            pl.BlockSpec(memory_space=pltpu.MemorySpace.VMEM),
        ],
        out_specs=pl.BlockSpec((None, 1, tb), lambda i: (i, 0, 0)),
        compiler_params=pltpu.CompilerParams(
            dimension_semantics=("parallel",)),
    )(h_ids, t_ids, emb_t, rel_col)


class EvaluationModelPallas:
    """JAX/Pallas port of EvaluationModel with a TransE (L2) kge_method."""

    def __init__(self, entity_emb, relation_emb, graph_ids, relation_id):
        entity_emb = jnp.asarray(entity_emb, jnp.float32)      # (num_entities, D)
        relation_emb = jnp.asarray(relation_emb, jnp.float32)  # (num_relations, D)
        # Pre-transpose once so the kernel runs in a triples-on-lanes layout.
        self.entity_emb_t = entity_emb.T                            # (D, E)
        self.rel_col = relation_emb[int(relation_id)][:, None]      # (D, 1)
        self.graph_ids = jnp.asarray(graph_ids, jnp.int32)          # (num_classes,), -1 if missing

    def forward(self, data, check_ids=False):
        data = jnp.asarray(data, dtype=jnp.int32)
        if data.shape[1] == 2:
            x_col, y_col = data[:, 0], data[:, 1]
        elif data.shape[1] == 3:
            x_col, y_col = data[:, 0], data[:, 2]
        else:
            raise ValueError(f"Data shape {data.shape} not recognized")

        # glue: class-id -> graph-entity-id lookup (pure index mapping)
        x = self.graph_ids[x_col]
        y = self.graph_ids[y_col]

        if check_ids:
            # Original module's sanity asserts (all referenced classes found in
            # graph).  Behind a flag: the int() forces a device->host sync.
            # Note: checks the columns actually used (incl. data[:,2] for 3-col).
            assert int(jnp.min(x)) >= 0, f"min head graph id: {int(jnp.min(x))}"
            assert int(jnp.min(y)) >= 0, f"min tail graph id: {int(jnp.min(y))}"

        # pad batch to a multiple of TB; padded entries gather entity row 0 and
        # their scores are sliced off below (do not reduce over the raw output).
        b = x.shape[0]
        b_padded = ((b + TB - 1) // TB) * TB
        pad = b_padded - b
        h_ids = jnp.pad(x, (0, pad)).reshape(-1, 1, TB)
        t_ids = jnp.pad(y, (0, pad)).reshape(-1, 1, TB)

        scores = _score_triples_pallas(h_ids, t_ids, self.entity_emb_t, self.rel_col)
        return scores.reshape(-1)[:b][:, None]                  # (B, 1) == -score_hrt


if __name__ == "__main__":
    key = jax.random.PRNGKey(0)
    k_ent, k_rel, k_map, k_data = jax.random.split(key, 4)

    num_entities = 32
    num_relations = 4
    num_classes = 24
    embedding_size = 128
    batch = 8

    # deterministic synthetic "checkpoint"
    entity_emb = jax.random.normal(k_ent, (num_entities, embedding_size), jnp.float32)
    relation_emb = jax.random.normal(k_rel, (num_relations, embedding_size), jnp.float32)
    # class -> graph-entity mapping (all classes found, so no -1 entries)
    graph_ids = jax.random.permutation(
        k_map, jnp.arange(num_entities, dtype=jnp.int32))[:num_classes]
    relation_id = 2  # pretend id of 'http://arrow'

    model = EvaluationModelPallas(entity_emb, relation_emb, graph_ids, relation_id)

    # (B, 2) subsumption pairs of ontology-class ids
    data = jax.random.randint(k_data, (batch, 2), 0, num_classes, dtype=jnp.int32)

    scores = model.forward(data, check_ids=True)
    scores = jax.block_until_ready(scores)

    # pure-JAX reference check
    h = entity_emb[graph_ids[data[:, 0]]]
    t = entity_emb[graph_ids[data[:, 1]]]
    r = relation_emb[relation_id][None, :]
    ref = jnp.sqrt(jnp.sum((h + r - t) ** 2, axis=-1, keepdims=True))
    assert scores.shape == (batch, 1)
    assert jnp.allclose(scores, ref, rtol=1e-4, atol=1e-4), \
        float(jnp.max(jnp.abs(scores - ref)))

    print("KERNEL_OK")
</pallas_src>

<mosaic_0001>
module attributes {stable_mosaic.version = 11 : i64} {
  func.func @_score_kernel(%arg0: i32, %arg1: memref<1x1x256xi32, #tpu.memory_space<vmem>>, %arg2: memref<1x1x256xi32, #tpu.memory_space<vmem>>, %arg3: memref<128x32xf32, #tpu.memory_space<vmem>>, %arg4: memref<128x1xf32, #tpu.memory_space<vmem>>, %arg5: memref<1x1x256xf32, #tpu.memory_space<vmem>>) attributes {dimension_semantics = [#tpu.dimension_semantics<parallel>], iteration_bounds = array<i64: 1>, scalar_prefetch = 0 : i64, scratch_operands = 0 : i64, tpu.core_type = #tpu.core_type<tc>, window_params = [{transform_indices = @transform_0, window_bounds = array<i64: 1, 1, 256>}, {transform_indices = @transform_1, window_bounds = array<i64: 1, 1, 256>}, {pipeline_mode = #tpu.pipeline_mode<synchronous>, transform_indices = @transform_2, window_bounds = array<i64: 128, 32>}, {pipeline_mode = #tpu.pipeline_mode<synchronous>, transform_indices = @transform_3, window_bounds = array<i64: 128, 1>}, {transform_indices = @transform_4, window_bounds = array<i64: 1, 1, 256>}]} {
    %c0 = arith.constant 0 : index
    %c0_0 = arith.constant 0 : index
    %c0_1 = arith.constant 0 : index
    %0 = vector.load %arg1[%c0, %c0_0, %c0_1] : memref<1x1x256xi32, #tpu.memory_space<vmem>>, vector<1x1x256xi32>
    %1 = vector.shape_cast %0 : vector<1x1x256xi32> to vector<1x256xi32>
    %c0_2 = arith.constant 0 : index
    %c0_3 = arith.constant 0 : index
    %c0_4 = arith.constant 0 : index
    %2 = vector.load %arg2[%c0_2, %c0_3, %c0_4] : memref<1x1x256xi32, #tpu.memory_space<vmem>>, vector<1x1x256xi32>
    %3 = vector.shape_cast %2 : vector<1x1x256xi32> to vector<1x256xi32>
    %c0_5 = arith.constant 0 : index
    %c0_6 = arith.constant 0 : index
    %4 = vector.load %arg3[%c0_5, %c0_6] : memref<128x32xf32, #tpu.memory_space<vmem>>, vector<128x32xf32>
    %5 = tpu.iota {dimensions = array<i32: 0>} : vector<32x256xi32>
    %6 = vector.broadcast %1 : vector<1x256xi32> to vector<32x256xi32>
    %7 = arith.cmpi eq, %5, %6 : vector<32x256xi32>
    %8 = arith.extui %7 : vector<32x256xi1> to vector<32x256xi32>
    %9 = arith.sitofp %8 : vector<32x256xi32> to vector<32x256xf32>
    %10 = vector.broadcast %3 : vector<1x256xi32> to vector<32x256xi32>
    %11 = arith.cmpi eq, %5, %10 : vector<32x256xi32>
    %12 = arith.extui %11 : vector<32x256xi1> to vector<32x256xi32>
    %13 = arith.sitofp %12 : vector<32x256xi32> to vector<32x256xf32>
    %cst = arith.constant dense<0.000000e+00> : vector<128x256xf32>
    %14 = tpu.matmul %4, %9, %cst {dimension_numbers = #tpu.dot_dimension_numbers<[1], [0], [0], [1], [0, 0, 1, 1], [], []>, precision = #tpu.contract_precision<fp32>} : vector<128x32xf32>, vector<32x256xf32>, vector<128x256xf32> -> vector<128x256xf32>
    %cst_7 = arith.constant dense<0.000000e+00> : vector<128x256xf32>
    %15 = tpu.matmul %4, %13, %cst_7 {dimension_numbers = #tpu.dot_dimension_numbers<[1], [0], [0], [1], [0, 0, 1, 1], [], []>, precision = #tpu.contract_precision<fp32>} : vector<128x32xf32>, vector<32x256xf32>, vector<128x256xf32> -> vector<128x256xf32>
    %c0_8 = arith.constant 0 : index
    %c0_9 = arith.constant 0 : index
    %16 = vector.load %arg4[%c0_8, %c0_9] : memref<128x1xf32, #tpu.memory_space<vmem>>, vector<128x1xf32>
    %17 = vector.broadcast %16 : vector<128x1xf32> to vector<128x256xf32>
    %18 = arith.addf %14, %17 : vector<128x256xf32>
    %19 = arith.subf %18, %15 : vector<128x256xf32>
    %20 = arith.mulf %19, %19 : vector<128x256xf32>
    %cst_10 = arith.constant dense<0.000000e+00> : vector<256xf32>
    %21 = vector.multi_reduction <add>, %20, %cst_10 [0] : vector<128x256xf32> to vector<256xf32>
    %22 = vector.shape_cast %21 : vector<256xf32> to vector<1x256xf32>
    %23 = math.sqrt %22 : vector<1x256xf32>
    %c0_11 = arith.constant 0 : index
    %c0_12 = arith.constant 0 : index
    %c0_13 = arith.constant 0 : index
    %24 = vector.load %arg5[%c0_11, %c0_12, %c0_13] : memref<1x1x256xf32, #tpu.memory_space<vmem>>, vector<1x1x256xf32>
    %25 = vector.shape_cast %24 : vector<1x1x256xf32> to vector<1x256xf32>
    %26 = vector.shape_cast %23 : vector<1x256xf32> to vector<1x1x256xf32>
    tpu.vector_store %arg5[%c0_11, %c0_12, %c0_13], %26 {strides = array<i32>} : memref<1x1x256xf32, #tpu.memory_space<vmem>>, vector<1x1x256xf32>,
    return
  }
  func.func @transform_0(%arg0: i32) -> (i32, i32, i32) {
    %c0_i32 = arith.constant 0 : i32
    %c0_i32_0 = arith.constant 0 : i32
    %c0_i32_1 = arith.constant 0 : i32
    return %arg0, %c0_i32, %c0_i32_0 : i32, i32, i32
  }
  func.func @transform_1(%arg0: i32) -> (i32, i32, i32) {
    %c0_i32 = arith.constant 0 : i32
    %c0_i32_0 = arith.constant 0 : i32
    %c0_i32_1 = arith.constant 0 : i32
    return %arg0, %c0_i32, %c0_i32_0 : i32, i32, i32
  }
  func.func @transform_2(%arg0: i32) -> (i32, i32) {
    %c0_i32 = arith.constant 0 : i32
    %c0_i32_0 = arith.constant 0 : i32
    %c0_i32_1 = arith.constant 0 : i32
    return %c0_i32, %c0_i32_0 : i32, i32
  }
  func.func @transform_3(%arg0: i32) -> (i32, i32) {
    %c0_i32 = arith.constant 0 : i32
    %c0_i32_0 = arith.constant 0 : i32
    %c0_i32_1 = arith.constant 0 : i32
    return %c0_i32, %c0_i32_0 : i32, i32
  }
  func.func @transform_4(%arg0: i32) -> (i32, i32, i32) {
    %c0_i32 = arith.constant 0 : i32
    %c0_i32_0 = arith.constant 0 : i32
    %c0_i32_1 = arith.constant 0 : i32
    return %arg0, %c0_i32, %c0_i32_0 : i32, i32, i32
  }
}

</mosaic_0001>

<bundles_post_ra>
// kernel: _score_triples_pallas.1
= control target key start
LH: loop header
LB: loop body
LE: loop exit
PB: predicated region body
PF: predicated region fallthrough
CT: control target
= control target key end

     0   :  { %v4753_v0 = vlaneseq  ;;  %vm105_vm0 = vcmask 261120   ;;  %v4791_v2 = vmov 0.0   ;;  %s4748_s0 = inlined_call_operand.vmem [shape: s32[1,1,256], index: 0, kind: input, shape index: {}]   ;;  %s4749_s1 = inlined_call_operand.vmem [shape: s32[1,1,256], index: 1, kind: input, shape index: {}]   ;;  %s4750_s2 = inlined_call_operand.vmem [shape: f32[128,32], index: 2, kind: input, shape index: {}]   ;;  %s4751_s3 = inlined_call_operand.vmem [shape: f32[128,1], index: 3, kind: input, shape index: {}]   ;;  %s4752_s4 = inlined_call_operand.hbm [shape: f32[1,1,256], index: 4, kind: output, shape index: {}]  }
   0x1   :  { %v20_v1 = vld [vmem:[%s4750_s2] sm:$0xff]  ;;  %226 = vmatprep.mubr.f32.mxu0 %v4791_v2  ;;  %v21_v4 = vld [vmem:[%s4750_s2 + $0x8] sm:$0xff]  ;;  %v22_v5 = vld [vmem:[%s4750_s2 + $0x10] sm:$0xff]  ;;  %507 = vmatprep.mubr.f32.mxu1 %v4791_v2 }
   0x2   :  { %v107_v3 = vsel %vm105_vm0, %v20_v1, 0  ;;  %v23_v6 = vld [vmem:[%s4750_s2 + $0x18] sm:$0xff]  ;;  %v3106_v7 = vshrl.u32 %v4753_v0, 7  ;;  %v110_v9 = vsel %vm105_vm0, %v21_v4, 0  ;;  %v113_v10 = vsel %vm105_vm0, %v22_v5, 0  ;;  %v24_v11 = vld [vmem:[%s4750_s2 + $0x20] sm:$0xff] }
   0x3   :  { %v3108_v8 = vand.u32 4294901760, %v107_v3  ;;  %v19_v12 = vld [vmem:[%s4749_s1] sm:$0x3]  ;;  %v3118_v13 = vand.u32 4294901760, %v110_v9  ;;  %v3120_v14 = vand.u32 4294901760, %v113_v10  ;;  %v3123_v15 = vsel %vm105_vm0, %v23_v6, 0 }
   0x4   :  { %4841 = vst [vmem:[#allocation5_spill] sm:$0xff] %v3106_v7  ;;  %v3126_v16 = vsel %vm105_vm0, %v24_v11, 0  ;;  %v3129_v17 = vadd.s32 24, %v3106_v7  ;;  %v47_v18 = vsub.s32 1, %v3106_v7  ;;  %v43_v19 = vsub.s32 0, %v3106_v7 }
   0x5   :  { %4842 = vst [vmem:[#allocation6_spill] sm:$0xff] %v3108_v8  ;;  %4843 = vst [vmem:[#allocation7_spill] sm:$0xff] %v3118_v13  ;;  %v3134_v20 = vadd.s32 16, %v3106_v7  ;;  %v3137_v21 = vadd.s32 8, %v3106_v7  ;;  %v3140_v22 = vsub.f32 %v107_v3, %v3108_v8  ;;  %v3143_v23 = vsub.f32 %v110_v9, %v3118_v13 }
   0x6   :  { %4844 = vst [vmem:[#allocation8_spill] sm:$0xff] %v3120_v14  ;;  %v3146_v24 = vsub.f32 %v113_v10, %v3120_v14  ;;  %v3150_v25 = vrot.slane %v19_v12, %v47_v18  ;;  %v3154_v26 = vrot.slane %v19_v12, %v43_v19  ;;  %v3157_v27 = vand.u32 4294901760, %v3123_v15 }
   0x7   :  { %4845 = vst [vmem:[#allocation9_spill] sm:$0xff] %v3140_v22  ;;  %v3160_v28 = vand.u32 4294901760, %v3140_v22  ;;  %v3163_v29 = vand.u32 4294901760, %v3143_v23  ;;  %v3169_v31 = vand.u32 4294901760, %v3126_v16 }
   0x8   :  { %4846 = vst [vmem:[#allocation10_spill] sm:$0xff] %v3157_v27  ;;  %v3166_v30 = vand.u32 4294901760, %v3146_v24 }
   0x9   :  { %4847 = vst [vmem:[#allocation11_spill] sm:$0xff] %v3169_v31 }
   0xa   :  { %9 = vsyncpa [#allocation3], 0  ;;  %vm88_vm1 = vcmp.eq.s32.totalorder %v3129_v17, %v3150_v25  ;;  %vm87_vm2 = vcmp.eq.s32.totalorder %v3129_v17, %v3154_v26  ;;  %vm86_vm3 = vcmp.eq.s32.totalorder %v3134_v20, %v3150_v25  ;;  %vm85_vm4 = vcmp.eq.s32.totalorder %v3134_v20, %v3154_v26  ;;  %v25_v57 = vld [vmem:[%s4750_s2 + $0x28] sm:$0xff]  ;;  %v26_v10 = vld [vmem:[%s4750_s2 + $0x30] sm:$0xff] }
   0xb   :  { %v4764_v32 = vmov 1.0   ;;  %v2976_v33 = vsel %vm86_vm3, 1.0, %v4791_v2  ;;  %v2975_v34 = vsel %vm85_vm4, 1.0, %v4791_v2  ;;  %vm84_vm5 = vcmp.eq.s32.totalorder %v3137_v21, %v3150_v25 }
   0xc   :  { %2979 = vmatprep.subr.msk.mxu0 %vm88_vm1, %v4764_v32  ;;  %vm83_vm6 = vcmp.eq.s32.totalorder %v3137_v21, %v3154_v26  ;;  %v3199_v35 = vsub.f32 %v2976_v33, %v2976_v33  ;;  %v3201_v36 = vsub.f32 %v2975_v34, %v2975_v34  ;;  %v2974_v37 = vsel %vm84_vm5, 1.0, %v4791_v2 }
   0xd   :  { %2980 = vmatpush1.msk.msra.mxu0 %vm87_vm2, %v4764_v32  ;;  %v2973_v38 = vsel %vm83_vm6, 1.0, %v4791_v2  ;;  %v3215_v39 = vsub.f32 %v2974_v37, %v2974_v37  ;;  %vm82_vm7 = vcmp.eq.s32.totalorder %v3106_v7, %v3150_v25  ;;  %vm81_vm8 = vcmp.eq.s32.totalorder %v3106_v7, %v3154_v26 }
   0xe   :  { %2981 = vmatprep.subr.msk.mxu0 %vm86_vm3, %v4764_v32  ;;  %v3217_v40 = vsub.f32 %v2973_v38, %v2973_v38  ;;  %v2972_v41 = vsel %vm82_vm7, 1.0, %v4791_v2  ;;  %v2971_v42 = vsel %vm81_vm8, 1.0, %v4791_v2  ;;  %v230_v43 = vsub.f32 %v3140_v22, %v3160_v28 }
   0xf   :  { %2982 = vmatpush1.msk.msra.mxu0 %vm85_vm4, %v4764_v32  ;;  %v2978_v44 = vsel %vm88_vm1, 1.0, %v4791_v2  ;;  %v3245_v45 = vsub.f32 %v2972_v41, %v2972_v41  ;;  %v3247_v46 = vsub.f32 %v2971_v42, %v2971_v42  ;;  %v2977_v48 = vsel %vm87_vm2, 1.0, %v4791_v2  ;;  %v27_v42 = vld [vmem:[%s4750_s2 + $0x38] sm:$0xff] }
  0x10   :  { %2983 = vmatprep.subr.msk.mxu0 %vm84_vm5, %v4764_v32  ;;  %v3249_v47 = vsub.f32 %v2978_v44, %v2978_v44  ;;  %v3259_v49 = vand.u32 4294901760, %v230_v43  ;;  %v3261_v50 = vsub.f32 %v2977_v48, %v2977_v48  ;;  %v4759_v51 = vand.u32 4294901760, %v3199_v35 }
  0x11   :  { %2984 = vmatpush1.msk.msra.mxu0 %vm83_vm6, %v4764_v32  ;;  %v241_v52 = vsub.f32 %v3143_v23, %v3163_v29  ;;  %v4758_v54 = vand.u32 4294901760, %v3201_v36  ;;  %v4757_v55 = vand.u32 4294901760, %v3215_v39  ;;  %v4756_v56 = vand.u32 4294901760, %v3217_v40 }
  0x12   :  { %4848 = vst [vmem:[#allocation12_spill] sm:$0xff] %v3259_v49  ;;  %2985 = vmatprep.subr.msk.mxu0 %vm82_vm7, %v4764_v32  ;;  %v429_v53 = vand.u32 4294901760, %v3249_v47  ;;  %v4760_v58 = vand.u32 4294901760, %v3261_v50  ;;  %v442_v59 = vsub.f32 %v3199_v35, %v4759_v51  ;;  %v4755_v61 = vand.u32 4294901760, %v3245_v45 }
  0x13   :  { %2986 = vmatpush1.msk.msra.mxu0 %vm81_vm8, %v4764_v32  ;;  %v3285_v60 = vand.u32 4294901760, %v241_v52  ;;  %v448_v63 = vsub.f32 %v3201_v36, %v4758_v54  ;;  %v454_v1 = vsub.f32 %v3215_v39, %v4757_v55  ;;  %v460_v3 = vsub.f32 %v3217_v40, %v4756_v56  ;;  %v32_v56 = vld [vmem:[%s4750_s2 + $0x60] sm:$0xff] }
  0x14   :  { %232 = vmatmul.mubr.f32.vlgmr.msra.gmra.mxu0 %v3259_v49  ;;  %v430_v62 = vsub.f32 %v3249_v47, %v429_v53  ;;  %v436_v4 = vsub.f32 %v3261_v50, %v4760_v58  ;;  %v466_v5 = vsub.f32 %v3245_v45, %v4755_v61  ;;  %646 = vmatprep.subr.mxu0 %v3249_v47  ;;  %v122_v9 = vsel %vm105_vm0, %v25_v57, 0 }
  0x15   :  { %4849 = vst [vmem:[#allocation13_spill] sm:$0xff] %v3285_v60  ;;  %237 = vmatprep.mubr.f32.mxu0 %v4791_v2  ;;  %v252_v6 = vsub.f32 %v3146_v24, %v3166_v30  ;;  %v443_v12 = vand.u32 4294901760, %v442_v59  ;;  %v449_v33 = vand.u32 4294901760, %v448_v63  ;;  %649 = vmatpush1.msra.mxu0 %v3261_v50  ;;  %v455_v37 = vand.u32 4294901760, %v454_v1 }
  0x16   :  { %v431_v11 = vand.u32 4294901760, %v430_v62  ;;  %v437_v34 = vand.u32 4294901760, %v436_v4  ;;  %v4754_v41 = vand.u32 4294901760, %v3247_v46  ;;  %652 = vmatprep.subr.mxu0 %v3199_v35  ;;  %v3326_v43 = vsub.f32 %v3123_v15, %v3157_v27  ;;  %v28_v15 = vld [vmem:[%s4750_s2 + $0x40] sm:$0xff] }
  0x17   :  { %v3316_v38 = vand.u32 4294901760, %v252_v6  ;;  %v3330_v44 = vsub.f32 %v3126_v16, %v3169_v31  ;;  %v3332_v48 = vand.u32 4294901760, %v122_v9  ;;  %v125_v52 = vsel %vm105_vm0, %v26_v10, 0  ;;  %655 = vmatpush1.msra.mxu0 %v3201_v36 }
  0x18   :  { %432 = vmatprep.subr.mxu1 %v431_v11  ;;  %243 = vmatmul.mubr.f32.gmra.mxu0 %v3285_v60  ;;  %v461_v57 = vand.u32 4294901760, %v460_v3  ;;  %v467_v59 = vand.u32 4294901760, %v466_v5  ;;  %v472_v62 = vsub.f32 %v3247_v46, %v4754_v41  ;;  %v3339_v63 = vand.u32 4294901760, %v125_v52  ;;  %v35_v60 = vld [vmem:[%s4750_s2 + $0x78] sm:$0xff] }
  0x19   :  { %4850 = vst [vmem:[#allocation14_spill] sm:$0xff] %v3316_v38  ;;  %4851 = vst [vmem:[#allocation15_spill] sm:$0xff] %v3332_v48  ;;  %438 = vmatpush1.msra.mxu1 %v437_v34  ;;  %248 = vmatprep.mubr.f32.mxu0 %v4791_v2  ;;  %v3345_v16 = vand.u32 4294901760, %v3326_v43  ;;  %v3348_v1 = vand.u32 4294901760, %v3330_v44  ;;  %v3351_v3 = vsub.f32 %v122_v9, %v3332_v48  ;;  %v128_v4 = vsel %vm105_vm0, %v27_v42, 0  ;;  %v29_v34 = vld [vmem:[%s4750_s2 + $0x48] sm:$0xff] }
  0x1a   :  { %4852 = vst [vmem:[#allocation16_spill] sm:$0xff] %v3339_v63  ;;  %444 = vmatprep.subr.mxu1 %v443_v12  ;;  %v473_v5 = vand.u32 4294901760, %v472_v62  ;;  %658 = vmatprep.subr.mxu0 %v3215_v39  ;;  %v131_v10 = vsel %vm105_vm0, %v28_v15, 0  ;;  %v3367_v12 = vsub.f32 %v125_v52, %v3339_v63  ;;  %v134_v52 = vsel %vm105_vm0, %v29_v34, 0 }
  0x1b   :  { %4853 = vst [vmem:[#allocation17_spill] sm:$0xff] %v3348_v1  ;;  %450 = vmatpush1.msra.mxu1 %v449_v33  ;;  %v263_v6 = vsub.f32 %v3326_v43, %v3345_v16  ;;  %v274_v9 = vsub.f32 %v3330_v44, %v3348_v1  ;;  %v3364_v11 = vand.u32 4294901760, %v3351_v3  ;;  %v3369_v33 = vand.u32 4294901760, %v128_v4  ;;  %661 = vmatpush1.msra.mxu0 %v3217_v40 }
  0x1c   :  { %456 = vmatprep.subr.mxu1 %v455_v37  ;;  %254 = vmatmul.mubr.f32.gmra.mxu0 %v3316_v38  ;;  %4855 = vst [vmem:[#allocation19_spill] sm:$0xff] %v3367_v12  ;;  %v3383_v42 = vand.u32 4294901760, %v131_v10  ;;  %v3396_v62 = vand.u32 4294901760, %v3367_v12  ;;  %v143_v55 = vsel %vm105_vm0, %v32_v56, 0  ;;  %v33_v56 = vld [vmem:[%s4750_s2 + $0x68] sm:$0xff]  ;;  %v152_v49 = vsel %vm105_vm0, %v35_v60, 0 }
  0x1d   :  { %462 = vmatpush1.msra.mxu1 %v461_v57  ;;  %259 = vmatprep.mubr.f32.mxu0 %v4791_v2  ;;  %4854 = vst [vmem:[#allocation18_spill] sm:$0xff] %v3364_v11  ;;  %4856 = vst [vmem:[#allocation20_spill] sm:$0xff] %v3369_v33  ;;  %v3374_v37 = vand.u32 4294901760, %v263_v6  ;;  %v3391_v57 = vand.u32 4294901760, %v274_v9  ;;  %v3399_v15 = vsub.f32 %v128_v4, %v3369_v33  ;;  %v18_v4 = vld [vmem:[%s4748_s0] sm:$0x3] }
  0x1e   :  { %468 = vmatprep.subr.mxu1 %v467_v59  ;;  %664 = vmatprep.subr.mxu0 %v3245_v45  ;;  %4858 = vst [vmem:[#allocation22_spill] sm:$0xff] %v3383_v42  ;;  %v285_v59 = vsub.f32 %v3351_v3, %v3364_v11  ;;  %4860 = vst [vmem:[#allocation24_spill] sm:$0xff] %v3396_v62  ;;  %v3416_v6 = vsub.f32 %v131_v10, %v3383_v42  ;;  %v3418_v9 = vand.u32 4294901760, %v134_v52  ;;  %v31_v10 = vld [vmem:[%s4750_s2 + $0x58] sm:$0xff] }
  0x1f   :  { %4857 = vst [vmem:[#allocation21_spill] sm:$0xff] %v3374_v37  ;;  %474 = vmatpush1.msra.mxu1 %v473_v5  ;;  %4859 = vst [vmem:[#allocation23_spill] sm:$0xff] %v3391_v57  ;;  %v30_v5 = vld [vmem:[%s4750_s2 + $0x50] sm:$0xff]  ;;  %667 = vmatpush1.msra.mxu0 %v3247_v46  ;;  %v296_v0 = vsub.f32 %v3367_v12, %v3396_v62  ;;  %v3429_v41 = vand.u32 4294901760, %v3399_v15 }
  0x20   :  { %509 = vmatmul.mubr.f32.vlgmr.msra.gmra.mxu1 %v3108_v8  ;;  %2987 = vmatprep.subr.msk.mxu1 %vm88_vm1, %v4764_v32  ;;  %4861 = vst [vmem:[#allocation25_spill] sm:$0xff] %v3399_v15  ;;  %4862 = vst [vmem:[#allocation26_spill] sm:$0xff] %v3416_v6  ;;  %v3424_v34 = vand.u32 4294901760, %v285_v59  ;;  %v137_v47 = vsel %vm105_vm0, %v30_v5, 0  ;;  %v3450_v59 = vrot.slane %v18_v4, %v47_v18  ;;  %v3454_v5 = vand.u32 4294901760, %v3416_v6 }
  0x21   :  { %2988 = vmatpush1.msk.msra.mxu1 %vm87_vm2, %v4764_v32  ;;  %265 = vmatmul.mubr.f32.gmra.mxu0 %v3374_v37  ;;  %4863 = vst [vmem:[#allocation27_spill] sm:$0xff] %v3418_v9  ;;  %4865 = vst [vmem:[#allocation29_spill] sm:$0xff] %v3429_v41  ;;  %v3463_v61 = vand.u32 4294901760, %v296_v0  ;;  %v307_v18 = vsub.f32 %v3399_v15, %v3429_v41  ;;  %v140_v0 = vsel %vm105_vm0, %v31_v10, 0 }
  0x22   :  { %514 = vmatprep.mubr.f32.mxu1 %v4791_v2  ;;  %270 = vmatprep.mubr.f32.mxu0 %v4791_v2  ;;  %4864 = vst [vmem:[#allocation28_spill] sm:$0xff] %v3424_v34  ;;  %4866 = vst [vmem:[#allocation30_spill] sm:$0xff] %v3454_v5  ;;  %vm56_vm10 = vcmp.eq.s32.totalorder %v3129_v17, %v3450_v59  ;;  %vm54_vm11 = vcmp.eq.s32.totalorder %v3134_v20, %v3450_v59  ;;  %v3500_v58 = vand.u32 4294901760, %v140_v0 }
  0x23   :  { %2989 = vmatprep.subr.msk.mxu1 %vm86_vm3, %v4764_v32  ;;  %1073 = vmatprep.subr.mxu0 %v429_v53  ;;  %v3439_v53 = vrot.slane %v18_v4, %v43_v19  ;;  %v3457_v19 = vsub.f32 %v134_v52, %v3418_v9  ;;  %4868 = vst [vmem:[#allocation32_spill] sm:$0xff] %v3463_v61  ;;  %v3467_v4 = vand.u32 4294901760, %v137_v47  ;;  %v3492_v10 = vand.u32 4294901760, %v307_v18 }
  0x24   :  { %516 = vmatmul.mubr.f32.gmra.mxu1 %v3118_v13  ;;  %v318_v52 = vsub.f32 %v3416_v6, %v3454_v5  ;;  %4873 = vst [vmem:[#allocation37_spill] sm:$0xff] %v3500_v58  ;;  %v146_v18 = vsel %vm105_vm0, %v33_v56, 0  ;;  %v34_v56 = vld [vmem:[%s4750_s2 + $0x70] sm:$0xff]  ;;  %vm52_vm13 = vcmp.eq.s32.totalorder %v3137_v21, %v3450_v59  ;;  %v2968_v26 = vsel %vm54_vm11, 1.0, %v4791_v2 }
  0x25   :  { %276 = vmatmul.mubr.f32.gmra.mxu0 %v3391_v57  ;;  %521 = vmatprep.mubr.f32.mxu1 %v4791_v2  ;;  %4867 = vst [vmem:[#allocation31_spill] sm:$0xff] %v3457_v19  ;;  %vm55_vm9 = vcmp.eq.s32.totalorder %v3129_v17, %v3439_v53  ;;  %4869 = vst [vmem:[#allocation33_spill] sm:$0xff] %v3467_v4  ;;  %v3495_v54 = vand.u32 4294901760, %v3457_v19  ;;  %v3498_v51 = vsub.f32 %v137_v47, %v3467_v4 }
  0x26   :  { %281 = vmatprep.mubr.f32.mxu0 %v4791_v2  ;;  %2990 = vmatpush1.msk.msra.mxu1 %vm85_vm4, %v4764_v32  ;;  %4870 = vst [vmem:[#allocation34_spill] sm:$0xff] %v3492_v10  ;;  %vm53_vm12 = vcmp.eq.s32.totalorder %v3134_v20, %v3439_v53  ;;  %v3517_v47 = vand.u32 4294901760, %v143_v55  ;;  %vm51_vm14 = vcmp.eq.s32.totalorder %v3137_v21, %v3439_v53  ;;  %v2969_v25 = vsel %vm55_vm9, 1.0, %v4791_v2 }
  0x27   :  { %2991 = vmatprep.subr.msk.mxu1 %vm84_vm5, %v4764_v32  ;;  %4871 = vst [vmem:[#allocation35_spill] sm:$0xff] %v3495_v54  ;;  %4872 = vst [vmem:[#allocation36_spill] sm:$0xff] %v3498_v51  ;;  %v3527_v57 = vand.u32 4294901760, %v3498_v51  ;;  %vm50_vm15 = vcmp.eq.s32.totalorder %v3106_v7, %v3450_v59 }
  0x28   :  { %523 = vmatmul.mubr.f32.gmra.mxu1 %v3120_v14  ;;  %4874 = vst [vmem:[#allocation38_spill] sm:$0xff] %v3517_v47  ;;  %v3549_v38 = vsub.f32 %v143_v55, %v3517_v47 }
  0x29   :  { %287 = vmatmul.mubr.f32.gmra.mxu0 %v3424_v34  ;;  %528 = vmatprep.mubr.f32.mxu1 %v4791_v2  ;;  %v329_v34 = vsub.f32 %v3457_v19, %v3495_v54  ;;  %4876 = vst [vmem:[#allocation40_spill] sm:$0xff] %v3527_v57 }
  0x2a   :  { %292 = vmatprep.mubr.f32.mxu0 %v4791_v2  ;;  %2992 = vmatpush1.msk.msra.mxu1 %vm83_vm6, %v4764_v32  ;;  %4881 = vst [vmem:[#allocation45_spill] sm:$0xff] %v3549_v38 }
  0x2b   :  { %2993 = vmatprep.subr.msk.mxu1 %vm82_vm7, %v4764_v32 }
  0x2c   :  { %530 = vmatmul.mubr.f32.gmra.mxu1 %v3157_v27 }
  0x2d   :  { %298 = vmatmul.mubr.f32.gmra.mxu0 %v3463_v61  ;;  %535 = vmatprep.mubr.f32.mxu1 %v4791_v2  ;;  %v3522_v61 = vand.u32 4294901760, %v318_v52  ;;  %v3541_v52 = vand.u32 4294901760, %v329_v34 }
  0x2e   :  { %303 = vmatprep.mubr.f32.mxu0 %v4791_v2  ;;  %2994 = vmatpush1.msk.msra.mxu1 %vm81_vm8, %v4764_v32 }
  0x2f   :  { %2995 = vmatprep.subr.msk.mxu1 %vm88_vm1, %v4764_v32  ;;  %4875 = vst [vmem:[#allocation39_spill] sm:$0xff] %v3522_v61  ;;  %v3530_v32 = vsub.f32 %v140_v0, %v3500_v58  ;;  %4879 = vst [vmem:[#allocation43_spill] sm:$0xff] %v3541_v52  ;;  %v340_v0 = vsub.f32 %v3498_v51, %v3527_v57 }
  0x30   :  { %537 = vmatmul.mubr.f32.gmra.mxu1 %v3169_v31  ;;  %v3568_v31 = vand.u32 4294901760, %v3549_v38 }
  0x31   :  { %309 = vmatmul.mubr.f32.gmra.mxu0 %v3492_v10  ;;  %542 = vmatprep.mubr.f32.mxu1 %v4791_v2  ;;  %4877 = vst [vmem:[#allocation41_spill] sm:$0xff] %v3530_v32  ;;  %v3537_v10 = vand.u32 4294901760, %v146_v18  ;;  %v3546_v37 = vand.u32 4294901760, %v3530_v32  ;;  %v3563_v55 = vand.u32 4294901760, %v340_v0 }
  0x32   :  { %314 = vmatprep.mubr.f32.mxu0 %v4791_v2  ;;  %4884 = vst [vmem:[#allocation48_spill] sm:$0xff] %v3568_v31 }
  0x33   :  { %4878 = vst [vmem:[#allocation42_spill] sm:$0xff] %v3537_v10  ;;  %4880 = vst [vmem:[#allocation44_spill] sm:$0xff] %v3546_v37  ;;  %v3558_v34 = vsub.f32 %v146_v18, %v3537_v10  ;;  %v3577_v18 = vand.u32 4294901760, %v152_v49 }
  0x34   :  { %544 = vmatmul.mubr.f32.gmra.mxu1 %v3332_v48  ;;  %4883 = vst [vmem:[#allocation47_spill] sm:$0xff] %v3563_v55  ;;  %v351_v48 = vsub.f32 %v3530_v32, %v3546_v37 }
  0x35   :  { %320 = vmatmul.mubr.f32.gmra.mxu0 %v3522_v61  ;;  %549 = vmatprep.mubr.f32.mxu1 %v4791_v2  ;;  %v149_v61 = vsel %vm105_vm0, %v34_v56, 0  ;;  %4882 = vst [vmem:[#allocation46_spill] sm:$0xff] %v3558_v34  ;;  %v3575_v60 = vand.u32 4294901760, %v3558_v34  ;;  %vm49_vm0 = vcmp.eq.s32.totalorder %v3106_v7, %v3439_v53 }
  0x36   :  { %325 = vmatprep.mubr.f32.mxu0 %v4791_v2  ;;  %v3570_v56 = vand.u32 4294901760, %v149_v61  ;;  %v3583_v0 = vand.u32 4294901760, %v351_v48 }
  0x37   :  { %4885 = vst [vmem:[#allocation49_spill] sm:$0xff] %v3575_v60  ;;  %v373_v48 = vsub.f32 %v3558_v34, %v3575_v60 }
  0x38   :  { %551 = vmatmul.mubr.f32.gmra.mxu1 %v3339_v63  ;;  %4886 = vst [vmem:[#allocation50_spill] sm:$0xff] %v3583_v0  ;;  %v3588_v63 = vsub.f32 %v149_v61, %v3570_v56  ;;  %v3604_v61 = vsub.f32 %v152_v49, %v3577_v18 }
  0x39   :  { %331 = vmatmul.mubr.f32.gmra.mxu0 %v3541_v52  ;;  %556 = vmatprep.mubr.f32.mxu1 %v4791_v2  ;;  %v362_v52 = vsub.f32 %v3549_v38, %v3568_v31 }
  0x3a   :  { %336 = vmatprep.mubr.f32.mxu0 %v4791_v2  ;;  %4887 = vst [vmem:[#allocation51_spill] sm:$0xff] %v3588_v63  ;;  %4890 = vst [vmem:[#allocation54_spill] sm:$0xff] %v3604_v61 }
  0x3c   :  { %558 = vmatmul.mubr.f32.gmra.mxu1 %v3369_v33  ;;  %v3601_v33 = vand.u32 4294901760, %v3588_v63 }
  0x3d   :  { %342 = vmatmul.mubr.f32.gmra.mxu0 %v3563_v55  ;;  %563 = vmatprep.mubr.f32.mxu1 %v4791_v2  ;;  %v3596_v55 = vand.u32 4294901760, %v362_v52 }
  0x3e   :  { %347 = vmatprep.mubr.f32.mxu0 %v4791_v2  ;;  %4889 = vst [vmem:[#allocation53_spill] sm:$0xff] %v3601_v33  ;;  %v384_v52 = vsub.f32 %v3588_v63, %v3601_v33 }
  0x3f   :  { %4888 = vst [vmem:[#allocation52_spill] sm:$0xff] %v3596_v55 }
  0x40   :  { %565 = vmatmul.mubr.f32.gmra.mxu1 %v3383_v42  ;;  %v3615_v42 = vand.u32 4294901760, %v3604_v61  ;;  %v3621_v49 = vand.u32 4294901760, %v384_v52  ;;  %v4893_v52 = vand.u32 4294901760, %v3261_v50  ;;  %v4897_v50 = vand.u32 4294901760, %v3217_v40 }
  0x41   :  { %353 = vmatmul.mubr.f32.gmra.mxu0 %v3583_v0  ;;  %570 = vmatprep.mubr.f32.mxu1 %v4791_v2  ;;  %v3610_v0 = vand.u32 4294901760, %v373_v48 }
  0x42   :  { %358 = vmatprep.mubr.f32.mxu0 %v4791_v2  ;;  %4891 = vst [vmem:[#allocation55_spill] sm:$0xff] %v3615_v42  ;;  %v395_v48 = vsub.f32 %v3604_v61, %v3615_v42 }
  0x44   :  { %572 = vmatmul.mubr.f32.gmra.mxu1 %v3418_v9 }
  0x45   :  { %364 = vmatmul.mubr.f32.gmra.mxu0 %v3596_v55  ;;  %577 = vmatprep.mubr.f32.mxu1 %v4791_v2  ;;  %v3629_v55 = vand.u32 4294901760, %v395_v48  ;;  %v4894_v48 = vand.u32 4294901760, %v3199_v35  ;;  %v4898_v35 = vand.u32 4294901760, %v3245_v45 }
  0x46   :  { %369 = vmatprep.mubr.f32.mxu0 %v4791_v2 }
  0x47   :  { %4892 = vst [vmem:[#allocation56_spill] sm:$0xff] %v3629_v55 }
  0x48   :  { %579 = vmatmul.mubr.f32.gmra.mxu1 %v3467_v4 }
  0x49   :  { %375 = vmatmul.mubr.f32.gmra.mxu0 %v3610_v0  ;;  %584 = vmatprep.mubr.f32.mxu1 %v4791_v2 }
  0x4a   :  { %380 = vmatprep.mubr.f32.mxu0 %v4791_v2 }
  0x4c   :  { %586 = vmatmul.mubr.f32.gmra.mxu1 %v3500_v58 }
  0x4d   :  { %386 = vmatmul.mubr.f32.gmra.mxu0 %v3621_v49  ;;  %591 = vmatprep.mubr.f32.mxu1 %v4791_v2 }
  0x4e   :  { %391 = vmatprep.mubr.f32.mxu0 %v4791_v2 }
  0x50   :  { %593 = vmatmul.mubr.f32.gmra.mxu1 %v3517_v47 }
  0x51   :  { %397 = vmatmul.mubr.f32.gmra.mxu0 %v3629_v55  ;;  %598 = vmatprep.mubr.f32.mxu1 %v4791_v2  ;;  %v4895_v55 = vand.u32 4294901760, %v3201_v36  ;;  %v2970_v36 = vsel %vm56_vm10, 1.0, %v4791_v2 }
  0x52   :  { %700 = vmatprep.mubr.f32.mxu0 %v4791_v2  ;;  %v3670_v40 = vsub.f32 %v2970_v36, %v2970_v36 }
  0x54   :  { %600 = vmatmul.mubr.f32.gmra.mxu1 %v3537_v10  ;;  %v4788_v45 = vand.u32 4294901760, %v3670_v40 }
  0x55   :  { %605 = vmatprep.mubr.f32.mxu1 %v4791_v2  ;;  %703 = vmatmul.mubr.f32.vlgmr.msra.gmra.mxu0 %v3140_v22  ;;  %v4896_v22 = vand.u32 4294901760, %v3215_v39  ;;  %v4900_v39 = vmov 1.0  }
  0x56   :  { %708 = vmatprep.mubr.f32.mxu0 %v4791_v2  ;;  %1077 = vmatpush1.msra.mxu0 %v4893_v52  ;;  %v3763_v52 = vsub.f32 %v2969_v25, %v2969_v25  ;;  %v2965_v25 = vsel %vm51_vm14, 1.0, %v4791_v2 }
  0x57   :  { %1081 = vmatprep.subr.mxu0 %v4894_v48  ;;  %v3766_v48 = vsub.f32 %v2968_v26, %v2968_v26  ;;  %v2964_v26 = vsel %vm50_vm15, 1.0, %v4791_v2 }
  0x58   :  { %607 = vmatmul.mubr.f32.gmra.mxu1 %v3570_v56  ;;  %1085 = vmatpush1.msra.mxu0 %v4895_v55  ;;  %v4790_v36 = vand.u32 4294901760, %v3763_v52 }
  0x59   :  { %612 = vmatprep.mubr.f32.mxu1 %v4791_v2  ;;  %711 = vmatmul.mubr.f32.gmra.mxu0 %v3143_v23 }
  0x5a   :  { %716 = vmatprep.mubr.f32.mxu0 %v4791_v2  ;;  %1089 = vmatprep.subr.mxu0 %v4896_v22  ;;  %v4899_v22 = vand.u32 4294901760, %v3247_v46  ;;  %v1804_v46 = vsub.f32 %v3670_v40, %v4788_v45  ;;  %v3822_v45 = vsub.f32 %v2965_v25, %v2965_v25 }
  0x5b   :  { %1093 = vmatpush1.msra.mxu0 %v4897_v50  ;;  %v2967_v50 = vsel %vm53_vm12, 1.0, %v4791_v2 }
  0x5c   :  { %614 = vmatmul.mubr.f32.gmra.mxu1 %v3577_v18  ;;  %1097 = vmatprep.subr.mxu0 %v4898_v35  ;;  %v1805_v55 = vand.u32 4294901760, %v1804_v46  ;;  %v2966_v35 = vsel %vm52_vm13, 1.0, %v4791_v2  ;;  %v4794_v46 = vand.u32 4294901760, %v3766_v48 }
  0x5d   :  { %719 = vmatmul.mubr.f32.gmra.mxu0 %v3146_v24  ;;  %901 = vmatprep.mubr.f32.mxu1 %v4791_v2 }
  0x5e   :  { %724 = vmatprep.mubr.f32.mxu0 %v4791_v2  ;;  %1101 = vmatpush1.msra.mxu0 %v4899_v22  ;;  %v3787_v22 = vsub.f32 %v2967_v50, %v2967_v50  ;;  %v1810_v50 = vsub.f32 %v3763_v52, %v4790_v36  ;;  %v4801_v36 = vand.u32 4294901760, %v3822_v45 }
  0x5f   :  { %3003 = vmatprep.subr.msk.mxu0 %vm56_vm10, %v4900_v39 }
  0x60   :  { %905 = vmatmul.mubr.f32.vlgmr.msra.gmra.mxu1 %v3160_v28  ;;  %v1811_v25 = vand.u32 4294901760, %v1810_v50 }
  0x61   :  { %2996 = vmatpush1.msk.msra.mxu1 %vm87_vm2, %v4900_v39  ;;  %727 = vmatmul.mubr.f32.gmra.mxu0 %v3326_v43 }
  0x62   :  { %910 = vmatprep.mubr.f32.mxu1 %v4791_v2  ;;  %732 = vmatprep.mubr.f32.mxu0 %v4791_v2 }
  0x63   :  { %2997 = vmatprep.subr.msk.mxu1 %vm86_vm3, %v4900_v39 }
  0x64   :  { %914 = vmatmul.mubr.f32.gmra.mxu1 %v3163_v29 }
  0x65   :  { %735 = vmatmul.mubr.f32.gmra.mxu0 %v3330_v44  ;;  %919 = vmatprep.mubr.f32.mxu1 %v4791_v2 }
  0x66   :  { %740 = vmatprep.mubr.f32.mxu0 %v4791_v2  ;;  %2998 = vmatpush1.msk.msra.mxu1 %vm85_vm4, %v4900_v39 }
  0x67   :  { %2999 = vmatprep.subr.msk.mxu1 %vm84_vm5, %v4900_v39 }
  0x68   :  { %923 = vmatmul.mubr.f32.gmra.mxu1 %v3166_v30 }
  0x69   :  { %743 = vmatmul.mubr.f32.gmra.mxu0 %v3351_v3  ;;  %928 = vmatprep.mubr.f32.mxu1 %v4791_v2 }
  0x6a   :  { %748 = vmatprep.mubr.f32.mxu0 %v4791_v2  ;;  %3000 = vmatpush1.msk.msra.mxu1 %vm83_vm6, %v4900_v39 }
  0x6b   :  { %3001 = vmatprep.subr.msk.mxu1 %vm82_vm7, %v4900_v39 }
  0x6c   :  { %932 = vmatmul.mubr.f32.gmra.mxu1 %v3345_v16 }
  0x6d   :  { %751 = vmatmul.mubr.f32.gmra.mxu0 %v3367_v12  ;;  %937 = vmatprep.mubr.f32.mxu1 %v4791_v2 }
  0x6e   :  { %756 = vmatprep.mubr.f32.mxu0 %v4791_v2  ;;  %3002 = vmatpush1.msk.msra.mxu1 %vm81_vm8, %v4900_v39 }
  0x6f   :  { %1806 = vmatprep.subr.mxu1 %v1805_v55  ;;  %v3794_v55 = vsub.f32 %v2966_v35, %v2966_v35  ;;  %v4901_v35 = vmov 0.0  }
  0x70   :  { %941 = vmatmul.mubr.f32.gmra.mxu1 %v3348_v1 }
  0x71   :  { %759 = vmatmul.mubr.f32.gmra.mxu0 %v3399_v15  ;;  %946 = vmatprep.mubr.f32.mxu1 %v4791_v2 }
  0x72   :  { %764 = vmatprep.mubr.f32.mxu0 %v4791_v2 }
  0x74   :  { %950 = vmatmul.mubr.f32.gmra.mxu1 %v3364_v11 }
  0x75   :  { %767 = vmatmul.mubr.f32.gmra.mxu0 %v3416_v6  ;;  %955 = vmatprep.mubr.f32.mxu1 %v4791_v2 }
  0x76   :  { %772 = vmatprep.mubr.f32.mxu0 %v4791_v2 }
  0x78   :  { %959 = vmatmul.mubr.f32.gmra.mxu1 %v3396_v62 }
  0x79   :  { %775 = vmatmul.mubr.f32.gmra.mxu0 %v3457_v19  ;;  %964 = vmatprep.mubr.f32.mxu1 %v4791_v2 }
  0x7a   :  { %780 = vmatprep.mubr.f32.mxu0 %v4791_v2 }
  0x7c   :  { %968 = vmatmul.mubr.f32.gmra.mxu1 %v3429_v41 }
  0x7d   :  { %783 = vmatmul.mubr.f32.gmra.mxu0 %v3498_v51  ;;  %973 = vmatprep.mubr.f32.mxu1 %v4791_v2 }
  0x7e   :  { %788 = vmatprep.mubr.f32.mxu0 %v4791_v2 }
  0x80   :  { %977 = vmatmul.mubr.f32.gmra.mxu1 %v3454_v5  ;;  %v4914_v5 = vld [vmem:[#allocation21_spill] sm:$0xff] }
  0x81   :  { %791 = vmatmul.mubr.f32.gmra.mxu0 %v3530_v32  ;;  %982 = vmatprep.mubr.f32.mxu1 %v4791_v2 }
  0x82   :  { %796 = vmatprep.mubr.f32.mxu0 %v4791_v2 }
  0x84   :  { %986 = vmatmul.mubr.f32.gmra.mxu1 %v3495_v54 }
  0x85   :  { %799 = vmatmul.mubr.f32.gmra.mxu0 %v3549_v38  ;;  %991 = vmatprep.mubr.f32.mxu1 %v4791_v2  ;;  %v1447_v38 = vld [vmem:[%s4751_s3 + $0x78] sm:$0xff] }
  0x86   :  { %804 = vmatprep.mubr.f32.mxu0 %v4791_v2 }
  0x88   :  { %995 = vmatmul.mubr.f32.gmra.mxu1 %v3527_v57  ;;  %v4912_v57 = vld [vmem:[#allocation14_spill] sm:$0xff] }
  0x89   :  { %807 = vmatmul.mubr.f32.gmra.mxu0 %v3558_v34  ;;  %1000 = vmatprep.mubr.f32.mxu1 %v4791_v2  ;;  %v3062_v34 = vmov 0  }
  0x8a   :  { %812 = vmatprep.mubr.f32.mxu0 %v4791_v2  ;;  %3032 = vset.pattern.permute.xlu0 %v3062_v34 }
  0x8b   :  { %3033 = vset.pattern.permute.xlu1 %v3062_v34  ;;  %v4908_v34 = vld [vmem:[#allocation20_spill] sm:$0xff] }
  0x8c   :  { %1004 = vmatmul.mubr.f32.gmra.mxu1 %v3546_v37 }
  0x8d   :  { %815 = vmatmul.mubr.f32.gmra.mxu0 %v3588_v63  ;;  %1009 = vmatprep.mubr.f32.mxu1 %v4791_v2 }
  0x8e   :  { %820 = vmatprep.mubr.f32.mxu0 %v4791_v2 }
  0x90   :  { %1013 = vmatmul.mubr.f32.gmra.mxu1 %v3568_v31  ;;  %v4903_v31 = vand.u32 4294901760, %v3794_v55 }
  0x91   :  { %823 = vmatmul.mubr.f32.gmra.mxu0 %v3604_v61  ;;  %1018 = vmatprep.mubr.f32.mxu1 %v4791_v2 }
  0x92   :  { %1134 = vmatprep.mubr.f32.mxu0 %v4791_v2  ;;  %v1828_v50 = vsub.f32 %v3794_v55, %v4903_v31 }
  0x94   :  { %1022 = vmatmul.mubr.f32.gmra.mxu1 %v3575_v60  ;;  %v2963_v60 = vsel %vm49_vm0, 1.0, %v4901_v35  ;;  %v1829_v63 = vand.u32 4294901760, %v1828_v50  ;;  %v1433_v50 = vld [vmem:[%s4751_s3 + $0x8] sm:$0xff] }
  0x95   :  { %1027 = vmatprep.mubr.f32.mxu1 %v4791_v2  ;;  %1136 = vmatmul.mubr.f32.vlgmr.msra.gmra.mxu0 %v3108_v8 }
  0x96   :  { %1141 = vmatprep.mubr.f32.mxu0 %v4791_v2  ;;  %3004 = vmatpush1.msk.msra.mxu0 %vm55_vm9, %v4900_v39 }
  0x97   :  { %3005 = vmatprep.subr.msk.mxu0 %vm54_vm11, %v4900_v39 }
  0x98   :  { %1031 = vmatmul.mubr.f32.gmra.mxu1 %v3601_v33  ;;  %3006 = vmatpush1.msk.msra.mxu0 %vm53_vm12, %v4900_v39  ;;  %v1816_v33 = vsub.f32 %v3766_v48, %v4794_v46 }
  0x99   :  { %1036 = vmatprep.mubr.f32.mxu1 %v4791_v2  ;;  %1143 = vmatmul.mubr.f32.gmra.mxu0 %v3118_v13 }
  0x9a   :  { %1148 = vmatprep.mubr.f32.mxu0 %v4791_v2  ;;  %3007 = vmatprep.subr.msk.mxu0 %vm52_vm13, %v4900_v39  ;;  %v3832_v2 = vsub.f32 %v2964_v26, %v2964_v26  ;;  %v4902_v26 = vand.u32 4294901760, %v3787_v22  ;;  %v1817_v61 = vand.u32 4294901760, %v1816_v33  ;;  %v1834_v33 = vsub.f32 %v3822_v45, %v4801_v36 }
  0x9b   :  { %3008 = vmatpush1.msk.msra.mxu0 %vm51_vm14, %v4900_v39 }
  0x9c   :  { %1040 = vmatmul.mubr.f32.gmra.mxu1 %v3615_v42  ;;  %3009 = vmatprep.subr.msk.mxu0 %vm50_vm15, %v4900_v39  ;;  %v1822_v46 = vsub.f32 %v3787_v22, %v4902_v26  ;;  %v3854_v42 = vsub.f32 %v2963_v60, %v2963_v60  ;;  %v1432_v26 = vld [vmem:[%s4751_s3] sm:$0xff]  ;;  %v1835_v36 = vand.u32 4294901760, %v1834_v33  ;;  %v1434_v33 = vld [vmem:[%s4751_s3 + $0x10] sm:$0xff] }
  0x9d   :  { %1150 = vmatmul.mubr.f32.gmra.mxu0 %v3120_v14  ;;  %1319 = vmatprep.mubr.f32.mxu1 %v4901_v35 }
  0x9e   :  { %1155 = vmatprep.mubr.f32.mxu0 %v4901_v35  ;;  %3010 = vmatpush1.msk.msra.mxu0 %vm49_vm0, %v4900_v39  ;;  %v1823_v60 = vand.u32 4294901760, %v1822_v46  ;;  %v4802_v31 = vand.u32 4294901760, %v3854_v42  ;;  %v4905_v46 = vld [vmem:[#allocation11_spill] sm:$0xff] }
  0x9f   :  { %2020 = vmatprep.subr.mxu0 %v3670_v40  ;;  %1450 = vperm.xlu0 %3032, %v1432_v26   ;;  %v4906_v26 = vld [vmem:[#allocation15_spill] sm:$0xff] }
  0xa0   :  { %1321 = vmatmul.mubr.f32.vlgmr.msra.gmra.mxu1 %v3108_v8  ;;  %1460 = vperm.xlu1 %3033, %v1434_v33   ;;  %v1440_v33 = vld [vmem:[%s4751_s3 + $0x40] sm:$0xff] }
  0xa1   :  { %1812 = vmatpush1.msra.mxu1 %v1811_v25  ;;  %1157 = vmatmul.mubr.f32.gmra.mxu0 %v3157_v27  ;;  %v4904_v25 = vand.u32 4294901760, %v3832_v2 }
  0xa2   :  { %1326 = vmatprep.mubr.f32.mxu1 %v4901_v35  ;;  %1162 = vmatprep.mubr.f32.mxu0 %v4901_v35 }
  0xa3   :  { %1818 = vmatprep.subr.mxu1 %v1817_v61  ;;  %v1840_v37 = vsub.f32 %v3832_v2, %v4904_v25  ;;  %v1846_v61 = vsub.f32 %v3854_v42, %v4802_v31  ;;  %1455 = vperm.xlu0 %3032, %v1433_v50   ;;  %v1437_v50 = vld [vmem:[%s4751_s3 + $0x28] sm:$0xff]  ;;  %v1446_v31 = vld [vmem:[%s4751_s3 + $0x70] sm:$0xff] }
  0xa4   :  { %1328 = vmatmul.mubr.f32.gmra.mxu1 %v3118_v13 }
  0xa5   :  { %1164 = vmatmul.mubr.f32.gmra.mxu0 %v4905_v46  ;;  %1333 = vmatprep.mubr.f32.mxu1 %v4901_v35  ;;  %v1841_v25 = vand.u32 4294901760, %v1840_v37  ;;  %v1435_v37 = vld [vmem:[%s4751_s3 + $0x18] sm:$0xff] }
  0xa6   :  { %1169 = vmatprep.mubr.f32.mxu0 %v4901_v35  ;;  %1824 = vmatpush1.msra.mxu1 %v1823_v60  ;;  %v1847_v60 = vand.u32 4294901760, %v1846_v61  ;;  %v4909_v61 = vld [vmem:[#allocation22_spill] sm:$0xff] }
  0xa7   :  { %1830 = vmatprep.subr.mxu1 %v1829_v63  ;;  %v4907_v63 = vld [vmem:[#allocation16_spill] sm:$0xff]  ;;  %1465 = vperm.xlu1 %3033, %v1435_v37   ;;  %v1441_v37 = vld [vmem:[%s4751_s3 + $0x48] sm:$0xff] }
  0xa8   :  { %1335 = vmatmul.mubr.f32.gmra.mxu1 %v3120_v14 }
  0xa9   :  { %1171 = vmatmul.mubr.f32.gmra.mxu0 %v4906_v26  ;;  %1340 = vmatprep.mubr.f32.mxu1 %v4901_v35 }
  0xaa   :  { %1176 = vmatprep.mubr.f32.mxu0 %v4901_v35  ;;  %1836 = vmatpush1.msra.mxu1 %v1835_v36  ;;  %v1436_v36 = vld [vmem:[%s4751_s3 + $0x20] sm:$0xff] }
  0xab   :  { %1842 = vmatprep.subr.mxu1 %v1841_v25  ;;  %1470 = vperm.xlu0 %3032, %v1436_v36   ;;  %v1438_v25 = vld [vmem:[%s4751_s3 + $0x30] sm:$0xff] }
  0xac   :  { %1342 = vmatmul.mubr.f32.gmra.mxu1 %v3157_v27  ;;  %1475 = vperm.xlu1 %3033, %v1437_v50   ;;  %v1442_v36 = vld [vmem:[%s4751_s3 + $0x50] sm:$0xff]  ;;  %v1443_v50 = vld [vmem:[%s4751_s3 + $0x58] sm:$0xff] }
  0xad   :  { %1178 = vmatmul.mubr.f32.gmra.mxu0 %v4907_v63  ;;  %1347 = vmatprep.mubr.f32.mxu1 %v4901_v35 }
  0xae   :  { %1183 = vmatprep.mubr.f32.mxu0 %v4901_v35  ;;  %1848 = vmatpush1.msra.mxu1 %v1847_v60  ;;  %v1439_v60 = vld [vmem:[%s4751_s3 + $0x38] sm:$0xff] }
  0xaf   :  { %3011 = vmatprep.subr.msk.mxu1 %vm56_vm10, %v4900_v39  ;;  %1480 = vperm.xlu0 %3032, %v1438_v25   ;;  %v1444_v25 = vld [vmem:[%s4751_s3 + $0x60] sm:$0xff] }
  0xb0   :  { %1349 = vmatmul.mubr.f32.gmra.mxu1 %v4905_v46  ;;  %1485 = vperm.xlu1 %3033, %v1439_v60  }
  0xb1   :  { %1185 = vmatmul.mubr.f32.gmra.mxu0 %v4908_v34  ;;  %1354 = vmatprep.mubr.f32.mxu1 %v4901_v35 }
  0xb2   :  { %1190 = vmatprep.mubr.f32.mxu0 %v4901_v35 }
  0xb3   :  { %1490 = vperm.xlu0 %3032, %v1440_v33   ;;  %v4910_v33 = vld [vmem:[#allocation12_spill] sm:$0xff] }
  0xb4   :  { %1356 = vmatmul.mubr.f32.gmra.mxu1 %v4906_v26  ;;  %1495 = vperm.xlu1 %3033, %v1441_v37  }
  0xb5   :  { %1192 = vmatmul.mubr.f32.gmra.mxu0 %v4909_v61  ;;  %1361 = vmatprep.mubr.f32.mxu1 %v4901_v35 }
  0xb6   :  { %1197 = vmatprep.mubr.f32.mxu0 %v4901_v35 }
  0xb7   :  { %1500 = vperm.xlu0 %3032, %v1442_v36   ;;  %v1445_v36 = vld [vmem:[%s4751_s3 + $0x68] sm:$0xff]  ;;  %s3064_s3 = smov [#allocation2]  }
  0xb8   :  { %1363 = vmatmul.mubr.f32.gmra.mxu1 %v4907_v63  ;;  %1505 = vperm.xlu1 %3033, %v1443_v50   ;;  %s2955_s25 = sshll.u32 %s3064_s3, 4  ;;  %s2956_s25 = int_to_ptr.vmem [resolvable:$true] %s2955_s25 }
  0xb9   :  { %1199 = vmatmul.mubr.f32.gmra.mxu0 %v3418_v9  ;;  %1368 = vmatprep.mubr.f32.mxu1 %v4901_v35  ;;  %s3038_s26 = scalar_lea.vmem %s2956_s25, 32  ;;  %p3043_p1 = scmp.lt.s32.totalorder %s2956_s25, %s2956_s25 }
  0xba   :  { %1204 = vmatprep.mubr.f32.mxu0 %v4901_v35  ;;  %p3039_p0 = scmp.ne.s32.totalorder %s2956_s25, %s3038_s26  ;;  %p3044_p2 = scmp.lt.s32.totalorder %s3038_s26, %s3038_s26 }
  0xbb   :  { %1510 = vperm.xlu0 %3032, %v1444_v25   ;;  %v4911_v25 = vld [vmem:[#allocation13_spill] sm:$0xff] }
  0xbc   :  { %1370 = vmatmul.mubr.f32.gmra.mxu1 %v4908_v34  ;;  %1515 = vperm.xlu1 %3033, %v1445_v36   ;;  %p3045_p3 = por %p3044_p2, %p3043_p1 }
  0xbd   :  { %1206 = vmatmul.mubr.f32.gmra.mxu0 %v3467_v4  ;;  %1375 = vmatprep.mubr.f32.mxu1 %v4901_v35 }
  0xbe   :  { %1211 = vmatprep.mubr.f32.mxu0 %v4901_v35  ;;  %p3046_p4 = pnand %p3045_p3, %p3039_p0 }
  0xbf   :  { %1520 = vperm.xlu0 %3032, %v1446_v31   ;;  %v4913_v31 = vand.u32 4294901760, %v3670_v40 }
  0xc0   :  { %1377 = vmatmul.mubr.f32.gmra.mxu1 %v4909_v61  ;;  %1525 = vperm.xlu1 %3033, %v1447_v38  }
  0xc1   :  { %1213 = vmatmul.mubr.f32.gmra.mxu0 %v3500_v58  ;;  %1382 = vmatprep.mubr.f32.mxu1 %v4901_v35 }
  0xc2   :  { %1218 = vmatprep.mubr.f32.mxu0 %v4901_v35 }
  0xc4   :  { %1384 = vmatmul.mubr.f32.gmra.mxu1 %v3418_v9 }
  0xc5   :  { %1220 = vmatmul.mubr.f32.gmra.mxu0 %v3517_v47  ;;  %1389 = vmatprep.mubr.f32.mxu1 %v4901_v35 }
  0xc6   :  { %1225 = vmatprep.mubr.f32.mxu0 %v4901_v35 }
  0xc8   :  { %1391 = vmatmul.mubr.f32.gmra.mxu1 %v3467_v4 }
  0xc9   :  { %1227 = vmatmul.mubr.f32.gmra.mxu0 %v3537_v10  ;;  %1396 = vmatprep.mubr.f32.mxu1 %v4901_v35 }
  0xca   :  { %1232 = vmatprep.mubr.f32.mxu0 %v4901_v35 }
  0xcc   :  { %1398 = vmatmul.mubr.f32.gmra.mxu1 %v3500_v58 }
  0xcd   :  { %1234 = vmatmul.mubr.f32.gmra.mxu0 %v3570_v56  ;;  %1403 = vmatprep.mubr.f32.mxu1 %v4901_v35 }
  0xce   :  { %1239 = vmatprep.mubr.f32.mxu0 %v4901_v35 }
  0xd0   :  { %1405 = vmatmul.mubr.f32.gmra.mxu1 %v3517_v47 }
  0xd1   :  { %1241 = vmatmul.mubr.f32.gmra.mxu0 %v3577_v18  ;;  %1410 = vmatprep.mubr.f32.mxu1 %v4901_v35 }
  0xd2   :  { %1600 = vmatprep.mubr.f32.mxu0 %v4901_v35 }
  0xd4   :  { %1412 = vmatmul.mubr.f32.gmra.mxu1 %v3537_v10  ;;  %v233_v60 = vpop.f32.mrf.mxu0 }
  0xd5   :  { %1417 = vmatprep.mubr.f32.mxu1 %v4901_v35  ;;  %1606 = vmatmul.mubr.f32.vlgmr.msra.gmra.mxu0 %v4910_v33 }
  0xd6   :  { %v235_v37 = vpop.f32.mrf.mxu0  ;;  %1611 = vmatprep.mubr.f32.mxu0 %v4901_v35  ;;  %2023 = vmatpush1.msra.mxu0 %v3763_v52 }
  0xd7   :  { %2026 = vmatprep.subr.mxu0 %v3766_v48 }
  0xd8   :  { %1419 = vmatmul.mubr.f32.gmra.mxu1 %v3570_v56  ;;  %v244_v50 = vpop.f32.mrf.mxu0  ;;  %2029 = vmatpush1.msra.mxu0 %v3787_v22 }
  0xd9   :  { %1424 = vmatprep.mubr.f32.mxu1 %v4901_v35  ;;  %1617 = vmatmul.mubr.f32.gmra.mxu0 %v4911_v25 }
  0xda   :  { %v246_v33 = vpop.f32.mrf.mxu0  ;;  %1622 = vmatprep.mubr.f32.mxu0 %v4901_v35  ;;  %2032 = vmatprep.subr.mxu0 %v3794_v55 }
  0xdb   :  { %2035 = vmatpush1.msra.mxu0 %v3822_v45 }
  0xdc   :  { %1426 = vmatmul.mubr.f32.gmra.mxu1 %v3577_v18  ;;  %v255_v36 = vpop.f32.mrf.mxu0  ;;  %2038 = vmatprep.subr.mxu0 %v3832_v2 }
  0xdd   :  { %1628 = vmatmul.mubr.f32.gmra.mxu0 %v4912_v57  ;;  %1881 = vmatprep.mubr.f32.mxu1 %v4901_v35 }
  0xde   :  { %v257_v25 = vpop.f32.mrf.mxu0  ;;  %1633 = vmatprep.mubr.f32.mxu0 %v4901_v35  ;;  %2041 = vmatpush1.msra.mxu0 %v3854_v42 }
  0xdf   :  { %2447 = vmatprep.subr.mxu0 %v4913_v31 }
  0xe0   :  { %v510_v54 = vpop.f32.mrf.mxu1  ;;  %1883 = vmatmul.mubr.f32.vlgmr.msra.gmra.mxu1 %v3108_v8 }
  0xe1   :  { %v3997_v32 = vadd.f32 %v510_v54, %v233_v60  ;;  %3012 = vmatpush1.msk.msra.mxu1 %vm55_vm9, %v4900_v39  ;;  %v266_v57 = vpop.f32.mrf.mxu0  ;;  %1639 = vmatmul.mubr.f32.gmra.mxu0 %v4914_v5  ;;  %v4915_v5 = vld [vmem:[#allocation23_spill] sm:$0xff] }
  0xe2   :  { %v512_v51 = vpop.f32.mrf.mxu1  ;;  %1888 = vmatprep.mubr.f32.mxu1 %v4901_v35  ;;  %1644 = vmatprep.mubr.f32.mxu0 %v4901_v35 }
  0xe3   :  { %v4006_v40 = vadd.f32 %v512_v51, %v235_v37  ;;  %v268_v38 = vpop.f32.mrf.mxu0  ;;  %3013 = vmatprep.subr.msk.mxu1 %vm54_vm11, %v4900_v39 }
  0xe4   :  { %v517_v54 = vpop.f32.mrf.mxu1  ;;  %1890 = vmatmul.mubr.f32.gmra.mxu1 %v3118_v13  ;;  %v4916_v13 = vld [vmem:[#allocation28_spill] sm:$0xff] }
  0xe5   :  { %v4013_v60 = vadd.f32 %v517_v54, %v244_v50  ;;  %v277_v31 = vpop.f32.mrf.mxu0  ;;  %1650 = vmatmul.mubr.f32.gmra.mxu0 %v4915_v5  ;;  %1895 = vmatprep.mubr.f32.mxu1 %v4901_v35 }
  0xe6   :  { %v519_v8 = vpop.f32.mrf.mxu1  ;;  %1655 = vmatprep.mubr.f32.mxu0 %v4901_v35  ;;  %3014 = vmatpush1.msk.msra.mxu1 %vm53_vm12, %v4900_v39 }
  0xe7   :  { %v4022_v51 = vadd.f32 %v519_v8, %v246_v33  ;;  %v279_v37 = vpop.f32.mrf.mxu0  ;;  %3015 = vmatprep.subr.msk.mxu1 %vm52_vm13, %v4900_v39 }
  0xe8   :  { %v524_v50 = vpop.f32.mrf.mxu1  ;;  %1897 = vmatmul.mubr.f32.gmra.mxu1 %v3120_v14  ;;  %v4917_v14 = vld [vmem:[#allocation32_spill] sm:$0xff] }
  0xe9   :  { %v4029_v54 = vadd.f32 %v524_v50, %v255_v36  ;;  %v288_v5 = vpop.f32.mrf.mxu0  ;;  %1661 = vmatmul.mubr.f32.gmra.mxu0 %v4916_v13  ;;  %1902 = vmatprep.mubr.f32.mxu1 %v4901_v35 }
  0xea   :  { %v526_v41 = vpop.f32.mrf.mxu1  ;;  %1666 = vmatprep.mubr.f32.mxu0 %v4901_v35  ;;  %3016 = vmatpush1.msk.msra.mxu1 %vm51_vm14, %v4900_v39 }
  0xeb   :  { %v4038_v8 = vadd.f32 %v526_v41, %v257_v25  ;;  %v290_v33 = vpop.f32.mrf.mxu0  ;;  %3017 = vmatprep.subr.msk.mxu1 %vm50_vm15, %v4900_v39 }
  0xec   :  { %v531_v36 = vpop.f32.mrf.mxu1  ;;  %1904 = vmatmul.mubr.f32.gmra.mxu1 %v3157_v27  ;;  %v4918_v27 = vld [vmem:[#allocation34_spill] sm:$0xff] }
  0xed   :  { %v4045_v13 = vadd.f32 %v531_v36, %v266_v57  ;;  %v299_v50 = vpop.f32.mrf.mxu0  ;;  %1672 = vmatmul.mubr.f32.gmra.mxu0 %v4917_v14  ;;  %1909 = vmatprep.mubr.f32.mxu1 %v4901_v35 }
  0xee   :  { %v533_v19 = vpop.f32.mrf.mxu1  ;;  %1677 = vmatprep.mubr.f32.mxu0 %v4901_v35  ;;  %3018 = vmatpush1.msk.msra.mxu1 %vm49_vm0, %v4900_v39 }
  0xef   :  { %v4054_v41 = vadd.f32 %v533_v19, %v268_v38  ;;  %v301_v25 = vpop.f32.mrf.mxu0  ;;  %3019 = vmatprep.subr.msk.mxu1 %vm56_vm10, %v4900_v39 }
  0xf0   :  { %v538_v57 = vpop.f32.mrf.mxu1  ;;  %1911 = vmatmul.mubr.f32.gmra.mxu1 %v4905_v46  ;;  %v4919_v46 = vld [vmem:[#allocation39_spill] sm:$0xff] }
  0xf1   :  { %v4061_v14 = vadd.f32 %v538_v57, %v277_v31  ;;  %v310_v36 = vpop.f32.mrf.mxu0  ;;  %1683 = vmatmul.mubr.f32.gmra.mxu0 %v4918_v27  ;;  %1916 = vmatprep.mubr.f32.mxu1 %v4901_v35 }
  0xf2   :  { %v540_v62 = vpop.f32.mrf.mxu1  ;;  %1688 = vmatprep.mubr.f32.mxu0 %v4901_v35 }
  0xf3   :  { %v4066_v19 = vadd.f32 %v540_v62, %v279_v37  ;;  %v312_v38 = vpop.f32.mrf.mxu0 }
  0xf4   :  { %v545_v6 = vpop.f32.mrf.mxu1  ;;  %1918 = vmatmul.mubr.f32.gmra.mxu1 %v4906_v26  ;;  %v4921_v26 = vld [vmem:[#allocation43_spill] sm:$0xff] }
  0xf5   :  { %v4069_v11 = vadd.f32 %v545_v6, %v288_v5  ;;  %v321_v15 = vpop.f32.mrf.mxu0  ;;  %1694 = vmatmul.mubr.f32.gmra.mxu0 %v4919_v46  ;;  %1923 = vmatprep.mubr.f32.mxu1 %v4901_v35 }
  0xf6   :  { %v547_v31 = vpop.f32.mrf.mxu1  ;;  %1699 = vmatprep.mubr.f32.mxu0 %v4901_v35 }
  0xf7   :  { %v4074_v27 = vadd.f32 %v547_v31, %v290_v33  ;;  %v323_v57 = vpop.f32.mrf.mxu0 }
  0xf8   :  { %v552_v1 = vpop.f32.mrf.mxu1  ;;  %1925 = vmatmul.mubr.f32.gmra.mxu1 %v4907_v63  ;;  %v4923_v63 = vld [vmem:[#allocation47_spill] sm:$0xff] }
  0xf9   :  { %v4077_v62 = vadd.f32 %v552_v1, %v299_v50  ;;  %v332_v37 = vpop.f32.mrf.mxu0  ;;  %1705 = vmatmul.mubr.f32.gmra.mxu0 %v4921_v26  ;;  %1930 = vmatprep.mubr.f32.mxu1 %v4901_v35 }
  0xfa   :  { %v554_v6 = vpop.f32.mrf.mxu1  ;;  %1710 = vmatprep.mubr.f32.mxu0 %v4901_v35 }
  0xfb   :  { %4920 = vst [vmem:[#allocation12_spill] sm:$0xff] %v4077_v62  ;;  %v4082_v46 = vadd.f32 %v554_v6, %v301_v25  ;;  %v334_v5 = vpop.f32.mrf.mxu0 }
  0xfc   :  { %v559_v12 = vpop.f32.mrf.mxu1  ;;  %1932 = vmatmul.mubr.f32.gmra.mxu1 %v4908_v34  ;;  %v4925_v34 = vld [vmem:[#allocation50_spill] sm:$0xff] }
  0xfd   :  { %v4085_v33 = vadd.f32 %v559_v12, %v310_v36  ;;  %v343_v31 = vpop.f32.mrf.mxu0  ;;  %1716 = vmatmul.mubr.f32.gmra.mxu0 %v4923_v63  ;;  %1937 = vmatprep.mubr.f32.mxu1 %v4901_v35 }
  0xfe   :  { %v561_v1 = vpop.f32.mrf.mxu1  ;;  %1721 = vmatprep.mubr.f32.mxu0 %v4901_v35 }
  0xff   :  { %4922 = vst [vmem:[#allocation13_spill] sm:$0xff] %v4085_v33  ;;  %v4090_v26 = vadd.f32 %v561_v1, %v312_v38  ;;  %v345_v50 = vpop.f32.mrf.mxu0 }
 0x100   :  { %v566_v62 = vpop.f32.mrf.mxu1  ;;  %1939 = vmatmul.mubr.f32.gmra.mxu1 %v4909_v61  ;;  %v4926_v61 = vld [vmem:[#allocation52_spill] sm:$0xff] }
 0x101   :  { %v4093_v25 = vadd.f32 %v566_v62, %v321_v15  ;;  %v354_v6 = vpop.f32.mrf.mxu0  ;;  %1727 = vmatmul.mubr.f32.gmra.mxu0 %v4925_v34  ;;  %1944 = vmatprep.mubr.f32.mxu1 %v4901_v35 }
 0x102   :  { %v568_v12 = vpop.f32.mrf.mxu1  ;;  %1732 = vmatprep.mubr.f32.mxu0 %v4901_v35 }
 0x103   :  { %4924 = vst [vmem:[#allocation14_spill] sm:$0xff] %v4093_v25  ;;  %v4098_v63 = vadd.f32 %v568_v12, %v323_v57  ;;  %v356_v36 = vpop.f32.mrf.mxu0 }
 0x104   :  { %v573_v33 = vpop.f32.mrf.mxu1  ;;  %1946 = vmatmul.mubr.f32.gmra.mxu1 %v3418_v9 }
 0x105   :  { %v4101_v38 = vadd.f32 %v573_v33, %v332_v37  ;;  %v365_v1 = vpop.f32.mrf.mxu0  ;;  %1738 = vmatmul.mubr.f32.gmra.mxu0 %v4926_v61  ;;  %1951 = vmatprep.mubr.f32.mxu1 %v4901_v35 }
 0x106   :  { %v575_v15 = vpop.f32.mrf.mxu1  ;;  %1743 = vmatprep.mubr.f32.mxu0 %v4901_v35 }
 0x107   :  { %v4106_v34 = vadd.f32 %v575_v15, %v334_v5  ;;  %v367_v62 = vpop.f32.mrf.mxu0 }
 0x108   :  { %v580_v25 = vpop.f32.mrf.mxu1  ;;  %1953 = vmatmul.mubr.f32.gmra.mxu1 %v3467_v4 }
 0x109   :  { %v4109_v57 = vadd.f32 %v580_v25, %v343_v31  ;;  %v376_v12 = vpop.f32.mrf.mxu0  ;;  %1749 = vmatmul.mubr.f32.gmra.mxu0 %v3610_v0  ;;  %1958 = vmatprep.mubr.f32.mxu1 %v4901_v35 }
 0x10a   :  { %v582_v37 = vpop.f32.mrf.mxu1  ;;  %1754 = vmatprep.mubr.f32.mxu0 %v4901_v35 }
 0x10b   :  { %v4114_v61 = vadd.f32 %v582_v37, %v345_v50  ;;  %v378_v33 = vpop.f32.mrf.mxu0 }
 0x10c   :  { %v587_v9 = vpop.f32.mrf.mxu1  ;;  %1960 = vmatmul.mubr.f32.gmra.mxu1 %v3500_v58  ;;  %v4928_v58 = vld [vmem:[#allocation56_spill] sm:$0xff] }
 0x10d   :  { %v4117_v5 = vadd.f32 %v587_v9, %v354_v6  ;;  %v387_v15 = vpop.f32.mrf.mxu0  ;;  %1760 = vmatmul.mubr.f32.gmra.mxu0 %v3621_v49  ;;  %1965 = vmatprep.mubr.f32.mxu1 %v4901_v35 }
 0x10e   :  { %v589_v31 = vpop.f32.mrf.mxu1  ;;  %1765 = vmatprep.mubr.f32.mxu0 %v4901_v35 }
 0x10f   :  { %4927 = vst [vmem:[#allocation21_spill] sm:$0xff] %v4117_v5  ;;  %v4122_v0 = vadd.f32 %v589_v31, %v356_v36  ;;  %v389_v25 = vpop.f32.mrf.mxu0 }
 0x110   :  { %v594_v4 = vpop.f32.mrf.mxu1  ;;  %1967 = vmatmul.mubr.f32.gmra.mxu1 %v3517_v47  ;;  %v4930_v47 = vand.u32 4294901760, %v3763_v52 }
 0x111   :  { %v4125_v50 = vadd.f32 %v594_v4, %v365_v1  ;;  %v398_v37 = vpop.f32.mrf.mxu0  ;;  %1771 = vmatmul.mubr.f32.gmra.mxu0 %v4928_v58  ;;  %1972 = vmatprep.mubr.f32.mxu1 %v4901_v35  ;;  %v4929_v4 = vld [vmem:[#allocation9_spill] sm:$0xff] }
 0x112   :  { %v596_v9 = vpop.f32.mrf.mxu1  ;;  %2074 = vmatprep.mubr.f32.mxu0 %v4901_v35 }
 0x113   :  { %v4130_v49 = vadd.f32 %v596_v9, %v367_v62  ;;  %v400_v6 = vpop.f32.mrf.mxu0 }
 0x114   :  { %v601_v5 = vpop.f32.mrf.mxu1  ;;  %1974 = vmatmul.mubr.f32.gmra.mxu1 %v3537_v10  ;;  %v4931_v10 = vand.u32 4294901760, %v3766_v48 }
 0x115   :  { %v4133_v36 = vadd.f32 %v601_v5, %v376_v12  ;;  %v704_v31 = vpop.f32.mrf.mxu0  ;;  %1979 = vmatprep.mubr.f32.mxu1 %v4901_v35  ;;  %2077 = vmatmul.mubr.f32.vlgmr.msra.gmra.mxu0 %v4929_v4  ;;  %v4932_v4 = vand.u32 4294901760, %v3787_v22  ;;  %v4934_v22 = vand.u32 4294901760, %v3822_v45  ;;  %v4936_v45 = vand.u32 4294901760, %v3854_v42 }
 0x116   :  { %v603_v1 = vpop.f32.mrf.mxu1  ;;  %v705_v58 = vadd.f32 %v704_v31, %v3997_v32  ;;  %2082 = vmatprep.mubr.f32.mxu0 %v4901_v35  ;;  %2451 = vmatpush1.msra.mxu0 %v4930_v47 }
 0x117   :  { %v4141_v62 = vadd.f32 %v603_v1, %v378_v33  ;;  %v706_v9 = vpop.f32.mrf.mxu0  ;;  %2455 = vmatprep.subr.mxu0 %v4931_v10  ;;  %v4933_v10 = vand.u32 4294901760, %v3794_v55 }
 0x118   :  { %v608_v12 = vpop.f32.mrf.mxu1  ;;  %1981 = vmatmul.mubr.f32.gmra.mxu1 %v3570_v56  ;;  %v707_v5 = vadd.f32 %v706_v9, %v4006_v40  ;;  %2459 = vmatpush1.msra.mxu0 %v4932_v4 }
 0x119   :  { %v4149_v32 = vadd.f32 %v608_v12, %v387_v15  ;;  %v712_v31 = vpop.f32.mrf.mxu0  ;;  %1986 = vmatprep.mubr.f32.mxu1 %v4901_v35  ;;  %2085 = vmatmul.mubr.f32.gmra.mxu0 %v3143_v23  ;;  %v4935_v23 = vand.u32 4294901760, %v3832_v2 }
 0x11a   :  { %v610_v47 = vpop.f32.mrf.mxu1  ;;  %v713_v52 = vadd.f32 %v712_v31, %v4013_v60  ;;  %2090 = vmatprep.mubr.f32.mxu0 %v4901_v35  ;;  %2463 = vmatprep.subr.mxu0 %v4933_v10 }
 0x11b   :  { %v4157_v48 = vadd.f32 %v610_v47, %v389_v25  ;;  %v714_v40 = vpop.f32.mrf.mxu0  ;;  %2467 = vmatpush1.msra.mxu0 %v4934_v22  ;;  %v4938_v22 = vld [vmem:[#allocation12_spill] sm:$0xff] }
 0x11c   :  { %v615_v33 = vpop.f32.mrf.mxu1  ;;  %1988 = vmatmul.mubr.f32.gmra.mxu1 %v3577_v18  ;;  %v715_v15 = vadd.f32 %v714_v40, %v4022_v51  ;;  %2471 = vmatprep.subr.mxu0 %v4935_v23  ;;  %v4937_v40 = vld [vmem:[#allocation19_spill] sm:$0xff] }
 0x11d   :  { %v4165_v60 = vadd.f32 %v615_v33, %v398_v37  ;;  %v720_v1 = vpop.f32.mrf.mxu0  ;;  %2093 = vmatmul.mubr.f32.gmra.mxu0 %v3146_v24  ;;  %2275 = vmatprep.mubr.f32.mxu1 %v4901_v35 }
 0x11e   :  { %v617_v55 = vpop.f32.mrf.mxu1  ;;  %v721_v25 = vadd.f32 %v720_v1, %v4029_v54  ;;  %2098 = vmatprep.mubr.f32.mxu0 %v4901_v35  ;;  %2475 = vmatpush1.msra.mxu0 %v4936_v45 }
 0x11f   :  { %v4173_v9 = vadd.f32 %v617_v55, %v400_v6  ;;  %v722_v51 = vpop.f32.mrf.mxu0 }
 0x120   :  { %v906_v2 = vpop.f32.mrf.mxu1  ;;  %2279 = vmatmul.mubr.f32.vlgmr.msra.gmra.mxu1 %v3160_v28  ;;  %v723_v37 = vadd.f32 %v722_v51, %v4038_v8  ;;  %v4941_v51 = vld [vmem:[#allocation13_spill] sm:$0xff] }
 0x121   :  { %v4177_v12 = vadd.f32 %v906_v2, %v705_v58  ;;  %3020 = vmatpush1.msk.msra.mxu1 %vm55_vm9, %v4900_v39  ;;  %v728_v24 = vpop.f32.mrf.mxu0  ;;  %2101 = vmatmul.mubr.f32.gmra.mxu0 %v3326_v43 }
 0x122   :  { %v908_v42 = vpop.f32.mrf.mxu1  ;;  %v729_v54 = vadd.f32 %v728_v24, %v4045_v13  ;;  %2284 = vmatprep.mubr.f32.mxu1 %v4901_v35  ;;  %2106 = vmatprep.mubr.f32.mxu0 %v4901_v35  ;;  %v4942_v24 = vld [vmem:[#allocation18_spill] sm:$0xff] }
 0x123   :  { %v4187_v28 = vadd.f32 %v908_v42, %v707_v5  ;;  %v730_v8 = vpop.f32.mrf.mxu0  ;;  %3021 = vmatprep.subr.msk.mxu1 %vm54_vm11, %v4900_v39 }
 0x124   :  { %v915_v17 = vpop.f32.mrf.mxu1  ;;  %2288 = vmatmul.mubr.f32.gmra.mxu1 %v3163_v29  ;;  %v731_v43 = vadd.f32 %v730_v8, %v4054_v41  ;;  %v4943_v8 = vld [vmem:[#allocation26_spill] sm:$0xff] }
 0x125   :  { %v4195_v6 = vadd.f32 %v915_v17, %v713_v52  ;;  %v736_v13 = vpop.f32.mrf.mxu0  ;;  %2109 = vmatmul.mubr.f32.gmra.mxu0 %v3330_v44  ;;  %2293 = vmatprep.mubr.f32.mxu1 %v4901_v35 }
 0x126   :  { %v917_v58 = vpop.f32.mrf.mxu1  ;;  %v737_v5 = vadd.f32 %v736_v13, %v4061_v14  ;;  %2114 = vmatprep.mubr.f32.mxu0 %v4901_v35  ;;  %3022 = vmatpush1.msk.msra.mxu1 %vm53_vm12, %v4900_v39 }
 0x127   :  { %v4205_v29 = vadd.f32 %v917_v58, %v715_v15  ;;  %v738_v41 = vpop.f32.mrf.mxu0  ;;  %3023 = vmatprep.subr.msk.mxu1 %vm52_vm13, %v4900_v39  ;;  %v4939_v15 = vld [vmem:[#allocation17_spill] sm:$0xff] }
 0x128   :  { %v924_v44 = vpop.f32.mrf.mxu1  ;;  %2297 = vmatmul.mubr.f32.gmra.mxu1 %v3166_v30  ;;  %v739_v14 = vadd.f32 %v738_v41, %v4066_v19 }
 0x129   :  { %v4213_v4 = vadd.f32 %v924_v44, %v721_v25  ;;  %v744_v31 = vpop.f32.mrf.mxu0  ;;  %2117 = vmatmul.mubr.f32.gmra.mxu0 %v3351_v3  ;;  %2302 = vmatprep.mubr.f32.mxu1 %v4901_v35  ;;  %v4940_v25 = vld [vmem:[#allocation25_spill] sm:$0xff]  ;;  %v4945_v44 = vld [vmem:[#allocation24_spill] sm:$0xff] }
 0x12a   :  { %v926_v20 = vpop.f32.mrf.mxu1  ;;  %v745_v47 = vadd.f32 %v744_v31, %v4069_v11  ;;  %2122 = vmatprep.mubr.f32.mxu0 %v4901_v35  ;;  %3024 = vmatpush1.msk.msra.mxu1 %vm51_vm14, %v4900_v39 }
 0x12b   :  { %v4223_v30 = vadd.f32 %v926_v20, %v723_v37  ;;  %v746_v19 = vpop.f32.mrf.mxu0  ;;  %3025 = vmatprep.subr.msk.mxu1 %vm50_vm15, %v4900_v39  ;;  %v4946_v20 = vld [vmem:[#allocation31_spill] sm:$0xff] }
 0x12c   :  { %v933_v3 = vpop.f32.mrf.mxu1  ;;  %2306 = vmatmul.mubr.f32.gmra.mxu1 %v3345_v16  ;;  %v747_v11 = vadd.f32 %v746_v19, %v4074_v27 }
 0x12d   :  { %v4231_v52 = vadd.f32 %v933_v3, %v729_v54  ;;  %v752_v10 = vpop.f32.mrf.mxu0  ;;  %2125 = vmatmul.mubr.f32.gmra.mxu0 %v4937_v40  ;;  %2311 = vmatprep.mubr.f32.mxu1 %v4901_v35  ;;  %v4947_v40 = vld [vmem:[#allocation29_spill] sm:$0xff] }
 0x12e   :  { %v935_v21 = vpop.f32.mrf.mxu1  ;;  %v753_v33 = vadd.f32 %v752_v10, %v4938_v22  ;;  %2130 = vmatprep.mubr.f32.mxu0 %v4901_v35  ;;  %3026 = vmatpush1.msk.msra.mxu1 %vm49_vm0, %v4900_v39 }
 0x12f   :  { %v4241_v16 = vadd.f32 %v935_v21, %v731_v43  ;;  %v754_v59 = vpop.f32.mrf.mxu0  ;;  %v4944_v43 = vld [vmem:[#allocation14_spill] sm:$0xff] }
 0x130   :  { %v942_v27 = vpop.f32.mrf.mxu1  ;;  %2315 = vmatmul.mubr.f32.gmra.mxu1 %v4939_v15  ;;  %v755_v23 = vadd.f32 %v754_v59, %v4082_v46 }
 0x131   :  { %v4245_v1 = vadd.f32 %v942_v27, %v737_v5  ;;  %v760_v55 = vpop.f32.mrf.mxu0  ;;  %2133 = vmatmul.mubr.f32.gmra.mxu0 %v4940_v25  ;;  %2320 = vmatprep.mubr.f32.mxu1 %v4901_v35 }
 0x132   :  { %v944_v45 = vpop.f32.mrf.mxu1  ;;  %v761_v2 = vadd.f32 %v760_v55, %v4941_v51  ;;  %2138 = vmatprep.mubr.f32.mxu0 %v4901_v35  ;;  %v4949_v55 = vld [vmem:[#allocation30_spill] sm:$0xff]  ;;  %v4950_v51 = vld [vmem:[#allocation41_spill] sm:$0xff] }
 0x133   :  { %v4251_v53 = vadd.f32 %v944_v45, %v739_v14  ;;  %v762_v39 = vpop.f32.mrf.mxu0 }
 0x134   :  { %v951_v37 = vpop.f32.mrf.mxu1  ;;  %2324 = vmatmul.mubr.f32.gmra.mxu1 %v4942_v24  ;;  %v763_v46 = vadd.f32 %v762_v39, %v4090_v26  ;;  %v4951_v39 = vld [vmem:[#allocation21_spill] sm:$0xff] }
 0x135   :  { %v4255_v42 = vadd.f32 %v951_v37, %v745_v47  ;;  %v768_v54 = vpop.f32.mrf.mxu0  ;;  %2141 = vmatmul.mubr.f32.gmra.mxu0 %v4943_v8  ;;  %2329 = vmatprep.mubr.f32.mxu1 %v4901_v35 }
 0x136   :  { %v953_v17 = vpop.f32.mrf.mxu1  ;;  %v769_v13 = vadd.f32 %v768_v54, %v4944_v43  ;;  %2146 = vmatprep.mubr.f32.mxu0 %v4901_v35  ;;  %v4952_v54 = vld [vmem:[#allocation35_spill] sm:$0xff]  ;;  %v4953_v43 = vld [vmem:[#allocation45_spill] sm:$0xff] }
 0x137   :  { %v4261_v58 = vadd.f32 %v953_v17, %v747_v11  ;;  %v770_v5 = vpop.f32.mrf.mxu0 }
 0x138   :  { %v960_v41 = vpop.f32.mrf.mxu1  ;;  %2333 = vmatmul.mubr.f32.gmra.mxu1 %v4945_v44  ;;  %v771_v26 = vadd.f32 %v770_v5, %v4098_v63 }
 0x139   :  { %v4265_v14 = vadd.f32 %v960_v41, %v753_v33  ;;  %v776_v31 = vpop.f32.mrf.mxu0  ;;  %2149 = vmatmul.mubr.f32.gmra.mxu0 %v4946_v20  ;;  %2338 = vmatprep.mubr.f32.mxu1 %v4901_v35  ;;  %v4948_v33 = vld [vmem:[#allocation36_spill] sm:$0xff] }
 0x13a   :  { %v962_v47 = vpop.f32.mrf.mxu1  ;;  %v777_v19 = vadd.f32 %v776_v31, %v4101_v38  ;;  %2154 = vmatprep.mubr.f32.mxu0 %v4901_v35  ;;  %v4954_v31 = vld [vmem:[#allocation40_spill] sm:$0xff] }
 0x13b   :  { %v4271_v3 = vadd.f32 %v962_v47, %v755_v23  ;;  %v778_v11 = vpop.f32.mrf.mxu0 }
 0x13c   :  { %v969_v10 = vpop.f32.mrf.mxu1  ;;  %2342 = vmatmul.mubr.f32.gmra.mxu1 %v4947_v40  ;;  %v779_v63 = vadd.f32 %v778_v11, %v4106_v34 }
 0x13d   :  { %v4275_v21 = vadd.f32 %v969_v10, %v761_v2  ;;  %v784_v22 = vpop.f32.mrf.mxu0  ;;  %2157 = vmatmul.mubr.f32.gmra.mxu0 %v4948_v33  ;;  %2347 = vmatprep.mubr.f32.mxu1 %v4901_v35 }
 0x13e   :  { %v971_v59 = vpop.f32.mrf.mxu1  ;;  %v785_v38 = vadd.f32 %v784_v22, %v4109_v57  ;;  %2162 = vmatprep.mubr.f32.mxu0 %v4901_v35  ;;  %v4956_v22 = vld [vmem:[#allocation44_spill] sm:$0xff] }
 0x13f   :  { %v4281_v27 = vadd.f32 %v971_v59, %v763_v46  ;;  %v786_v15 = vpop.f32.mrf.mxu0 }
 0x140   :  { %v978_v23 = vpop.f32.mrf.mxu1  ;;  %2351 = vmatmul.mubr.f32.gmra.mxu1 %v4949_v55  ;;  %v787_v34 = vadd.f32 %v786_v15, %v4114_v61 }
 0x141   :  { %v4285_v25 = vadd.f32 %v978_v23, %v769_v13  ;;  %v792_v45 = vpop.f32.mrf.mxu0  ;;  %2165 = vmatmul.mubr.f32.gmra.mxu0 %v4950_v51  ;;  %2356 = vmatprep.mubr.f32.mxu1 %v4901_v35 }
 0x142   :  { %v980_v2 = vpop.f32.mrf.mxu1  ;;  %v793_v57 = vadd.f32 %v792_v45, %v4951_v39  ;;  %2170 = vmatprep.mubr.f32.mxu0 %v4901_v35  ;;  %v4958_v45 = vld [vmem:[#allocation48_spill] sm:$0xff]  ;;  %v4959_v39 = vld [vmem:[#allocation54_spill] sm:$0xff] }
 0x143   :  { %v4291_v37 = vadd.f32 %v980_v2, %v771_v26  ;;  %v794_v24 = vpop.f32.mrf.mxu0 }
 0x144   :  { %v987_v46 = vpop.f32.mrf.mxu1  ;;  %2360 = vmatmul.mubr.f32.gmra.mxu1 %v4952_v54  ;;  %v795_v61 = vadd.f32 %v794_v24, %v4122_v0 }
 0x145   :  { %v4295_v8 = vadd.f32 %v987_v46, %v777_v19  ;;  %v800_v17 = vpop.f32.mrf.mxu0  ;;  %2173 = vmatmul.mubr.f32.gmra.mxu0 %v4953_v43  ;;  %2365 = vmatprep.mubr.f32.mxu1 %v4901_v35  ;;  %v4955_v19 = vld [vmem:[#allocation46_spill] sm:$0xff] }
 0x146   :  { %v989_v13 = vpop.f32.mrf.mxu1  ;;  %v801_v5 = vadd.f32 %v800_v17, %v4125_v50  ;;  %2178 = vmatprep.mubr.f32.mxu0 %v4901_v35 }
 0x147   :  { %v4301_v41 = vadd.f32 %v989_v13, %v779_v63  ;;  %v802_v44 = vpop.f32.mrf.mxu0  ;;  %v4961_v13 = vld [vmem:[#allocation6_spill] sm:$0xff] }
 0x148   :  { %v996_v26 = vpop.f32.mrf.mxu1  ;;  %2369 = vmatmul.mubr.f32.gmra.mxu1 %v4954_v31  ;;  %v803_v0 = vadd.f32 %v802_v44, %v4130_v49 }
 0x149   :  { %v4305_v20 = vadd.f32 %v996_v26, %v785_v38  ;;  %v808_v47 = vpop.f32.mrf.mxu0  ;;  %2181 = vmatmul.mubr.f32.gmra.mxu0 %v4955_v19  ;;  %2374 = vmatprep.mubr.f32.mxu1 %v4901_v35  ;;  %v4957_v38 = vld [vmem:[#allocation51_spill] sm:$0xff] }
 0x14a   :  { %v998_v11 = vpop.f32.mrf.mxu1  ;;  %v809_v50 = vadd.f32 %v808_v47, %v4133_v36  ;;  %2186 = vmatprep.mubr.f32.mxu0 %v4901_v35 }
 0x14b   :  { %v4311_v10 = vadd.f32 %v998_v11, %v787_v34  ;;  %v810_v40 = vpop.f32.mrf.mxu0  ;;  %v4963_v11 = vld [vmem:[#allocation7_spill] sm:$0xff] }
 0x14c   :  { %v1005_v63 = vpop.f32.mrf.mxu1  ;;  %2378 = vmatmul.mubr.f32.gmra.mxu1 %v4956_v22  ;;  %v811_v49 = vadd.f32 %v810_v40, %v4141_v62 }
 0x14d   :  { %v4315_v33 = vadd.f32 %v1005_v63, %v793_v57  ;;  %v816_v59 = vpop.f32.mrf.mxu0  ;;  %2189 = vmatmul.mubr.f32.gmra.mxu0 %v4957_v38  ;;  %2383 = vmatprep.mubr.f32.mxu1 %v4901_v35 }
 0x14e   :  { %v1007_v15 = vpop.f32.mrf.mxu1  ;;  %v817_v36 = vadd.f32 %v816_v59, %v4149_v32  ;;  %2194 = vmatprep.mubr.f32.mxu0 %v4901_v35 }
 0x14f   :  { %v4321_v23 = vadd.f32 %v1007_v15, %v795_v61  ;;  %v818_v55 = vpop.f32.mrf.mxu0  ;;  %v4960_v61 = vld [vmem:[#allocation49_spill] sm:$0xff]  ;;  %v4965_v15 = vld [vmem:[#allocation8_spill] sm:$0xff] }
 0x150   :  { %v1014_v34 = vpop.f32.mrf.mxu1  ;;  %2387 = vmatmul.mubr.f32.gmra.mxu1 %v4958_v45  ;;  %v819_v62 = vadd.f32 %v818_v55, %v4157_v48 }
 0x151   :  { %v4325_v51 = vadd.f32 %v1014_v34, %v801_v5  ;;  %v824_v2 = vpop.f32.mrf.mxu0  ;;  %2197 = vmatmul.mubr.f32.gmra.mxu0 %v4959_v39  ;;  %2392 = vmatprep.mubr.f32.mxu1 %v4901_v35  ;;  %v4966_v39 = vld [vmem:[#allocation10_spill] sm:$0xff] }
 0x152   :  { %v1016_v57 = vpop.f32.mrf.mxu1  ;;  %v825_v32 = vadd.f32 %v824_v2, %v4165_v60  ;;  %2508 = vmatprep.mubr.f32.mxu0 %v4901_v35 }
 0x153   :  { %v4331_v24 = vadd.f32 %v1016_v57, %v803_v0  ;;  %v826_v46 = vpop.f32.mrf.mxu0  ;;  %v4962_v0 = vld [vmem:[#allocation53_spill] sm:$0xff] }
 0x154   :  { %v1023_v54 = vpop.f32.mrf.mxu1  ;;  %2396 = vmatmul.mubr.f32.gmra.mxu1 %v4960_v61  ;;  %v827_v48 = vadd.f32 %v826_v46, %v4173_v9 }
 0x155   :  { %v4335_v17 = vadd.f32 %v1023_v54, %v809_v50  ;;  %v1137_v43 = vpop.f32.mrf.mxu0  ;;  %2401 = vmatprep.mubr.f32.mxu1 %v4901_v35  ;;  %2510 = vmatmul.mubr.f32.vlgmr.msra.gmra.mxu0 %v4961_v13 }
 0x156   :  { %v1025_v5 = vpop.f32.mrf.mxu1  ;;  %v1138_v60 = vadd.f32 %v1137_v43, %v4177_v12  ;;  %2515 = vmatprep.mubr.f32.mxu0 %v4901_v35  ;;  %v4967_v43 = vld [vmem:[#allocation11_spill] sm:$0xff] }
 0x157   :  { %v4341_v44 = vadd.f32 %v1025_v5, %v811_v49  ;;  %v1139_v26 = vpop.f32.mrf.mxu0  ;;  %v4964_v49 = vld [vmem:[#allocation55_spill] sm:$0xff] }
 0x158   :  { %v1032_v31 = vpop.f32.mrf.mxu1  ;;  %2405 = vmatmul.mubr.f32.gmra.mxu1 %v4962_v0  ;;  %v1140_v9 = vadd.f32 %v1139_v26, %v4187_v28 }
 0x159   :  { %v4345_v47 = vadd.f32 %v1032_v31, %v817_v36  ;;  %v1144_v19 = vpop.f32.mrf.mxu0  ;;  %2410 = vmatprep.mubr.f32.mxu1 %v4901_v35  ;;  %2517 = vmatmul.mubr.f32.gmra.mxu0 %v4963_v11 }
 0x15a   :  { %v1034_v50 = vpop.f32.mrf.mxu1  ;;  %v1145_v12 = vadd.f32 %v1144_v19, %v4195_v6  ;;  %2522 = vmatprep.mubr.f32.mxu0 %v4901_v35 }
 0x15b   :  { %v4351_v40 = vadd.f32 %v1034_v50, %v819_v62  ;;  %v1146_v63 = vpop.f32.mrf.mxu0 }
 0x15c   :  { %v1041_v22 = vpop.f32.mrf.mxu1  ;;  %2414 = vmatmul.mubr.f32.gmra.mxu1 %v4964_v49  ;;  %v1147_v28 = vadd.f32 %v1146_v63, %v4205_v29  ;;  %v4969_v49 = vld [vmem:[#allocation16_spill] sm:$0xff] }
 0x15d   :  { %v4355_v59 = vadd.f32 %v1041_v22, %v825_v32  ;;  %v1151_v38 = vpop.f32.mrf.mxu0  ;;  %2524 = vmatmul.mubr.f32.gmra.mxu0 %v4965_v15  ;;  %2693 = vmatprep.mubr.f32.mxu1 %v4901_v35 }
 0x15e   :  { %v1043_v36 = vpop.f32.mrf.mxu1  ;;  %v1152_v6 = vadd.f32 %v1151_v38, %v4213_v4  ;;  %2529 = vmatprep.mubr.f32.mxu0 %v4901_v35 }
 0x15f   :  { %v4361_v55 = vadd.f32 %v1043_v36, %v827_v48  ;;  %v1153_v34 = vpop.f32.mrf.mxu0 }
 0x160   :  { %v1322_v45 = vpop.f32.mrf.mxu1  ;;  %2695 = vmatmul.mubr.f32.vlgmr.msra.gmra.mxu1 %v4961_v13  ;;  %v1154_v29 = vadd.f32 %v1153_v34, %v4223_v30 }
 0x161   :  { %v4365_v62 = vadd.f32 %v1322_v45, %v1138_v60  ;;  %v1158_v2 = vpop.f32.mrf.mxu0  ;;  %2531 = vmatmul.mubr.f32.gmra.mxu0 %v4966_v39  ;;  %2700 = vmatprep.mubr.f32.mxu1 %v4901_v35  ;;  %v4970_v45 = vld [vmem:[#allocation20_spill] sm:$0xff] }
 0x162   :  { %v1324_v57 = vpop.f32.mrf.mxu1  ;;  %v1159_v4 = vadd.f32 %v1158_v2, %v4231_v52  ;;  %2536 = vmatprep.mubr.f32.mxu0 %v4901_v35 }
 0x163   :  { %v4371_v32 = vadd.f32 %v1324_v57, %v1140_v9  ;;  %v1160_v46 = vpop.f32.mrf.mxu0  ;;  %v4968_v9 = vld [vmem:[#allocation15_spill] sm:$0xff] }
 0x164   :  { %v1329_v54 = vpop.f32.mrf.mxu1  ;;  %2702 = vmatmul.mubr.f32.gmra.mxu1 %v4963_v11  ;;  %v1161_v30 = vadd.f32 %v1160_v46, %v4241_v16 }
 0x165   :  { %v4375_v61 = vadd.f32 %v1329_v54, %v1145_v12  ;;  %v1165_v48 = vpop.f32.mrf.mxu0  ;;  %2538 = vmatmul.mubr.f32.gmra.mxu0 %v4967_v43  ;;  %2707 = vmatprep.mubr.f32.mxu1 %v4901_v35  ;;  %v4971_v54 = vld [vmem:[#allocation22_spill] sm:$0xff] }
 0x166   :  { %v1331_v13 = vpop.f32.mrf.mxu1  ;;  %v1166_v52 = vadd.f32 %v1165_v48, %v4245_v1  ;;  %2543 = vmatprep.mubr.f32.mxu0 %v4901_v35 }
 0x167   :  { %v4381_v5 = vadd.f32 %v1331_v13, %v1147_v28  ;;  %v1167_v60 = vpop.f32.mrf.mxu0 }
 0x168   :  { %v1336_v26 = vpop.f32.mrf.mxu1  ;;  %2709 = vmatmul.mubr.f32.gmra.mxu1 %v4965_v15  ;;  %v1168_v16 = vadd.f32 %v1167_v60, %v4251_v53 }
 0x169   :  { %v4385_v31 = vadd.f32 %v1336_v26, %v1152_v6  ;;  %v1172_v0 = vpop.f32.mrf.mxu0  ;;  %2545 = vmatmul.mubr.f32.gmra.mxu0 %v4968_v9  ;;  %2714 = vmatprep.mubr.f32.mxu1 %v4901_v35  ;;  %v4972_v26 = vld [vmem:[#allocation27_spill] sm:$0xff] }
 0x16a   :  { %v1338_v19 = vpop.f32.mrf.mxu1  ;;  %v1173_v1 = vadd.f32 %v1172_v0, %v4255_v42  ;;  %2550 = vmatprep.mubr.f32.mxu0 %v4901_v35 }
 0x16b   :  { %v4391_v11 = vadd.f32 %v1338_v19, %v1154_v29  ;;  %v1174_v50 = vpop.f32.mrf.mxu0 }
 0x16c   :  { %v1343_v12 = vpop.f32.mrf.mxu1  ;;  %2716 = vmatmul.mubr.f32.gmra.mxu1 %v4966_v39  ;;  %v1175_v53 = vadd.f32 %v1174_v50, %v4261_v58 }
 0x16d   :  { %v4395_v63 = vadd.f32 %v1343_v12, %v1159_v4  ;;  %v1179_v22 = vpop.f32.mrf.mxu0  ;;  %2552 = vmatmul.mubr.f32.gmra.mxu0 %v4969_v49  ;;  %2721 = vmatprep.mubr.f32.mxu1 %v4901_v35  ;;  %v4975_v12 = vld [vmem:[#allocation33_spill] sm:$0xff] }
 0x16e   :  { %v1345_v28 = vpop.f32.mrf.mxu1  ;;  %v1180_v42 = vadd.f32 %v1179_v22, %v4265_v14  ;;  %2557 = vmatprep.mubr.f32.mxu0 %v4901_v35 }
 0x16f   :  { %v4401_v38 = vadd.f32 %v1345_v28, %v1161_v30  ;;  %v1181_v15 = vpop.f32.mrf.mxu0 }
 0x170   :  { %v1350_v36 = vpop.f32.mrf.mxu1  ;;  %2723 = vmatmul.mubr.f32.gmra.mxu1 %v4967_v43  ;;  %v1182_v58 = vadd.f32 %v1181_v15, %v4271_v3 }
 0x171   :  { %v4405_v6 = vadd.f32 %v1350_v36, %v1166_v52  ;;  %v1186_v34 = vpop.f32.mrf.mxu0  ;;  %2559 = vmatmul.mubr.f32.gmra.mxu0 %v4970_v45  ;;  %2728 = vmatprep.mubr.f32.mxu1 %v4901_v35  ;;  %v4978_v36 = vld [vmem:[#allocation37_spill] sm:$0xff] }
 0x172   :  { %v1352_v29 = vpop.f32.mrf.mxu1  ;;  %v1187_v14 = vadd.f32 %v1186_v34, %v4275_v21  ;;  %2564 = vmatprep.mubr.f32.mxu0 %v4901_v35 }
 0x173   :  { %v4411_v2 = vadd.f32 %v1352_v29, %v1168_v16  ;;  %v1188_v39 = vpop.f32.mrf.mxu0 }
 0x174   :  { %v1357_v57 = vpop.f32.mrf.mxu1  ;;  %2730 = vmatmul.mubr.f32.gmra.mxu1 %v4968_v9  ;;  %v1189_v3 = vadd.f32 %v1188_v39, %v4281_v27 }
 0x175   :  { %v4415_v4 = vadd.f32 %v1357_v57, %v1173_v1  ;;  %v1193_v46 = vpop.f32.mrf.mxu0  ;;  %2566 = vmatmul.mubr.f32.gmra.mxu0 %v4971_v54  ;;  %2735 = vmatprep.mubr.f32.mxu1 %v4901_v35  ;;  %v4981_v57 = vld [vmem:[#allocation38_spill] sm:$0xff] }
 0x176   :  { %v1359_v30 = vpop.f32.mrf.mxu1  ;;  %v1194_v21 = vadd.f32 %v1193_v46, %v4285_v25  ;;  %2571 = vmatprep.mubr.f32.mxu0 %v4901_v35 }
 0x177   :  { %v4421_v48 = vadd.f32 %v1359_v30, %v1175_v53  ;;  %v1195_v43 = vpop.f32.mrf.mxu0 }
 0x178   :  { %v1364_v13 = vpop.f32.mrf.mxu1  ;;  %2737 = vmatmul.mubr.f32.gmra.mxu1 %v4969_v49  ;;  %v1196_v27 = vadd.f32 %v1195_v43, %v4291_v37 }
 0x179   :  { %v4425_v52 = vadd.f32 %v1364_v13, %v1180_v42  ;;  %v1200_v60 = vpop.f32.mrf.mxu0  ;;  %2573 = vmatmul.mubr.f32.gmra.mxu0 %v4972_v26  ;;  %2742 = vmatprep.mubr.f32.mxu1 %v4901_v35  ;;  %v4984_v13 = vld [vmem:[#allocation42_spill] sm:$0xff] }
 0x17a   :  { %v1366_v16 = vpop.f32.mrf.mxu1  ;;  %v1201_v25 = vadd.f32 %v1200_v60, %v4295_v8  ;;  %2578 = vmatprep.mubr.f32.mxu0 %v4901_v35 }
 0x17b   :  { %v4431_v0 = vadd.f32 %v1366_v16, %v1182_v58  ;;  %v1202_v9 = vpop.f32.mrf.mxu0 }
 0x17c   :  { %v1371_v19 = vpop.f32.mrf.mxu1  ;;  %2744 = vmatmul.mubr.f32.gmra.mxu1 %v4970_v45  ;;  %v1203_v37 = vadd.f32 %v1202_v9, %v4301_v41 }
 0x17d   :  { %4973 = vst [vmem:[#allocation23_spill] sm:$0xff] %v4431_v0  ;;  %v4435_v1 = vadd.f32 %v1371_v19, %v1187_v14  ;;  %v1207_v50 = vpop.f32.mrf.mxu0  ;;  %2580 = vmatmul.mubr.f32.gmra.mxu0 %v4975_v12  ;;  %2749 = vmatprep.mubr.f32.mxu1 %v4901_v35 }
 0x17e   :  { %v1373_v53 = vpop.f32.mrf.mxu1  ;;  %v1208_v8 = vadd.f32 %v1207_v50, %v4305_v20  ;;  %2585 = vmatprep.mubr.f32.mxu0 %v4901_v35 }
 0x17f   :  { %4974 = vst [vmem:[#allocation28_spill] sm:$0xff] %v4435_v1  ;;  %v4441_v22 = vadd.f32 %v1373_v53, %v1189_v3  ;;  %v1209_v49 = vpop.f32.mrf.mxu0 }
 0x180   :  { %v1378_v28 = vpop.f32.mrf.mxu1  ;;  %2751 = vmatmul.mubr.f32.gmra.mxu1 %v4971_v54  ;;  %v1210_v41 = vadd.f32 %v1209_v49, %v4311_v10 }
 0x181   :  { %4976 = vst [vmem:[#allocation32_spill] sm:$0xff] %v4441_v22  ;;  %v4445_v42 = vadd.f32 %v1378_v28, %v1194_v21  ;;  %v1214_v15 = vpop.f32.mrf.mxu0  ;;  %2587 = vmatmul.mubr.f32.gmra.mxu0 %v4978_v36  ;;  %2756 = vmatprep.mubr.f32.mxu1 %v4901_v35 }
 0x182   :  { %v1380_v58 = vpop.f32.mrf.mxu1  ;;  %v1215_v20 = vadd.f32 %v1214_v15, %v4315_v33  ;;  %2592 = vmatprep.mubr.f32.mxu0 %v4901_v35 }
 0x183   :  { %4977 = vst [vmem:[#allocation34_spill] sm:$0xff] %v4445_v42  ;;  %v4451_v34 = vadd.f32 %v1380_v58, %v1196_v27  ;;  %v1216_v45 = vpop.f32.mrf.mxu0 }
 0x184   :  { %v1385_v29 = vpop.f32.mrf.mxu1  ;;  %2758 = vmatmul.mubr.f32.gmra.mxu1 %v4972_v26  ;;  %v1217_v10 = vadd.f32 %v1216_v45, %v4321_v23 }
 0x185   :  { %4979 = vst [vmem:[#allocation39_spill] sm:$0xff] %v4451_v34  ;;  %v4455_v14 = vadd.f32 %v1385_v29, %v1201_v25  ;;  %v1221_v39 = vpop.f32.mrf.mxu0  ;;  %2594 = vmatmul.mubr.f32.gmra.mxu0 %v4981_v57  ;;  %2763 = vmatprep.mubr.f32.mxu1 %v4901_v35 }
 0x186   :  { %v1387_v3 = vpop.f32.mrf.mxu1  ;;  %v1222_v33 = vadd.f32 %v1221_v39, %v4325_v51  ;;  %2599 = vmatprep.mubr.f32.mxu0 %v4901_v35 }
 0x187   :  { %4980 = vst [vmem:[#allocation43_spill] sm:$0xff] %v4455_v14  ;;  %v4461_v46 = vadd.f32 %v1387_v3, %v1203_v37  ;;  %v1223_v54 = vpop.f32.mrf.mxu0 }
 0x188   :  { %v1392_v30 = vpop.f32.mrf.mxu1  ;;  %2765 = vmatmul.mubr.f32.gmra.mxu1 %v4975_v12  ;;  %v1224_v23 = vadd.f32 %v1223_v54, %v4331_v24 }
 0x189   :  { %4982 = vst [vmem:[#allocation47_spill] sm:$0xff] %v4461_v46  ;;  %v4465_v21 = vadd.f32 %v1392_v30, %v1208_v8  ;;  %v1228_v43 = vpop.f32.mrf.mxu0  ;;  %2601 = vmatmul.mubr.f32.gmra.mxu0 %v4984_v13  ;;  %2770 = vmatprep.mubr.f32.mxu1 %v4901_v35 }
 0x18a   :  { %v1394_v27 = vpop.f32.mrf.mxu1  ;;  %v1229_v51 = vadd.f32 %v1228_v43, %v4335_v17  ;;  %2606 = vmatprep.mubr.f32.mxu0 %v4901_v35 }
 0x18b   :  { %4983 = vst [vmem:[#allocation50_spill] sm:$0xff] %v4465_v21  ;;  %v4471_v60 = vadd.f32 %v1394_v27, %v1210_v41  ;;  %v1230_v26 = vpop.f32.mrf.mxu0 }
 0x18c   :  { %v1399_v16 = vpop.f32.mrf.mxu1  ;;  %2772 = vmatmul.mubr.f32.gmra.mxu1 %v4978_v36  ;;  %v1231_v24 = vadd.f32 %v1230_v26, %v4341_v44 }
 0x18d   :  { %4985 = vst [vmem:[#allocation52_spill] sm:$0xff] %v4471_v60  ;;  %v4475_v25 = vadd.f32 %v1399_v16, %v1215_v20  ;;  %v1235_v9 = vpop.f32.mrf.mxu0  ;;  %2608 = vmatmul.mubr.f32.gmra.mxu0 %v3570_v56  ;;  %2777 = vmatprep.mubr.f32.mxu1 %v4901_v35  ;;  %v1461_v16 = vpop.permute.xlu1 %1460 }
 0x18e   :  { %v1401_v19 = vpop.f32.mrf.mxu1  ;;  %v1236_v17 = vadd.f32 %v1235_v9, %v4345_v47  ;;  %2613 = vmatprep.mubr.f32.mxu0 %v4901_v35 }
 0x18f   :  { %4986 = vst [vmem:[#allocation56_spill] sm:$0xff] %v4475_v25  ;;  %v4481_v37 = vadd.f32 %v1401_v19, %v1217_v10  ;;  %v1237_v50 = vpop.f32.mrf.mxu0 }
 0x190   :  { %v1406_v12 = vpop.f32.mrf.mxu1  ;;  %2779 = vmatmul.mubr.f32.gmra.mxu1 %v4981_v57  ;;  %v1238_v44 = vadd.f32 %v1237_v50, %v4351_v40 }
 0x191   :  { %4987 = vst [vmem:[#allocation9_spill] sm:$0xff] %v4481_v37  ;;  %v4485_v53 = vadd.f32 %v1406_v12, %v1222_v33  ;;  %v1242_v8 = vpop.f32.mrf.mxu0  ;;  %2615 = vmatmul.mubr.f32.gmra.mxu0 %v3577_v18  ;;  %2784 = vmatprep.mubr.f32.mxu1 %v4901_v35 }
 0x192   :  { %v1408_v49 = vpop.f32.mrf.mxu1  ;;  %v1243_v47 = vadd.f32 %v1242_v8, %v4355_v59  ;;  %v1451_v59 = vpop.permute.xlu0 %1450 }
 0x193   :  { %4988 = vst [vmem:[#allocation19_spill] sm:$0xff] %v4485_v53  ;;  %v4490_v28 = vadd.f32 %v1408_v49, %v1224_v23  ;;  %v1244_v41 = vpop.f32.mrf.mxu0 }
 0x194   :  { %v1413_v15 = vpop.f32.mrf.mxu1  ;;  %2786 = vmatmul.mubr.f32.gmra.mxu1 %v4984_v13  ;;  %v1245_v36 = vadd.f32 %v1244_v41, %v4361_v55 }
 0x195   :  { %4989 = vst [vmem:[#allocation12_spill] sm:$0xff] %v4490_v28  ;;  %v4494_v58 = vadd.f32 %v1413_v15, %v1229_v51  ;;  %v1607_v40 = vpop.f32.mrf.mxu0  ;;  %2791 = vmatprep.mubr.f32.mxu1 %v4901_v35  ;;  %v1466_v15 = vpop.permute.xlu1 %1465 }
 0x196   :  { %v1415_v20 = vpop.f32.mrf.mxu1  ;;  %v1608_v23 = vadd.f32 %v1607_v40, %v1451_v59  ;;  %v1456_v27 = vpop.permute.xlu0 %1455 }
 0x197   :  { %4990 = vst [vmem:[#allocation17_spill] sm:$0xff] %v4494_v58  ;;  %v4497_v45 = vadd.f32 %v1415_v20, %v1231_v24  ;;  %v1609_v29 = vpop.f32.mrf.mxu0 }
 0x198   :  { %v1420_v10 = vpop.f32.mrf.mxu1  ;;  %2793 = vmatmul.mubr.f32.gmra.mxu1 %v3570_v56  ;;  %v1610_v24 = vadd.f32 %v1609_v29, %v1451_v59 }
 0x199   :  { %4991 = vst [vmem:[#allocation25_spill] sm:$0xff] %v4497_v45  ;;  %v4500_v39 = vadd.f32 %v1420_v10, %v1236_v17  ;;  %v1618_v57 = vpop.f32.mrf.mxu0  ;;  %2798 = vmatprep.mubr.f32.mxu1 %v4901_v35 }
 0x19a   :  { %v1422_v3 = vpop.f32.mrf.mxu1  ;;  %v1619_v9 = vadd.f32 %v1618_v57, %v1456_v27 }
 0x19b   :  { %4992 = vst [vmem:[#allocation13_spill] sm:$0xff] %v4500_v39  ;;  %v4503_v55 = vadd.f32 %v1422_v3, %v1238_v44  ;;  %v1620_v33 = vpop.f32.mrf.mxu0 }
 0x19c   :  { %v1427_v54 = vpop.f32.mrf.mxu1  ;;  %2800 = vmatmul.mubr.f32.gmra.mxu1 %v3577_v18  ;;  %v1621_v44 = vadd.f32 %v1620_v33, %v1456_v27 }
 0x19d   :  { %4993 = vst [vmem:[#allocation18_spill] sm:$0xff] %v4503_v55  ;;  %v4506_v30 = vadd.f32 %v1427_v54, %v1243_v47  ;;  %v1629_v43 = vpop.f32.mrf.mxu0  ;;  %v1471_v54 = vpop.permute.xlu0 %1470 }
 0x19e   :  { %v1429_v13 = vpop.f32.mrf.mxu1  ;;  %v1630_v49 = vadd.f32 %v1629_v43, %v1461_v16 }
 0x19f   :  { %4994 = vst [vmem:[#allocation26_spill] sm:$0xff] %v4506_v30  ;;  %v4508_v56 = vadd.f32 %v1429_v13, %v1245_v36  ;;  %v1631_v51 = vpop.f32.mrf.mxu0 }
 0x1a0   :  { %v1884_v26 = vpop.f32.mrf.mxu1  ;;  %v1632_v29 = vadd.f32 %v1631_v51, %v1461_v16 }
 0x1a1   :  { %4995 = vst [vmem:[#allocation14_spill] sm:$0xff] %v4508_v56  ;;  %v4510_v35 = vadd.f32 %v1884_v26, %v1608_v23  ;;  %v1640_v19 = vpop.f32.mrf.mxu0 }
 0x1a2   :  { %v1886_v17 = vpop.f32.mrf.mxu1  ;;  %v1641_v59 = vadd.f32 %v1640_v19, %v1466_v15 }
 0x1a3   :  { %v4512_v50 = vadd.f32 %v1886_v17, %v1610_v24  ;;  %v1642_v18 = vpop.f32.mrf.mxu0  ;;  %v1476_v17 = vpop.permute.xlu1 %1475 }
 0x1a4   :  { %v1891_v12 = vpop.f32.mrf.mxu1  ;;  %v1643_v27 = vadd.f32 %v1642_v18, %v1466_v15 }
 0x1a5   :  { %v4514_v8 = vadd.f32 %v1891_v12, %v1619_v9  ;;  %v1651_v47 = vpop.f32.mrf.mxu0 }
 0x1a6   :  { %v1893_v41 = vpop.f32.mrf.mxu1  ;;  %v1652_v26 = vadd.f32 %v1651_v47, %v1471_v54 }
 0x1a7   :  { %v4516_v36 = vadd.f32 %v1893_v41, %v1621_v44  ;;  %v1653_v40 = vpop.f32.mrf.mxu0 }
 0x1a8   :  { %v1898_v20 = vpop.f32.mrf.mxu1  ;;  %v1654_v44 = vadd.f32 %v1653_v40, %v1471_v54 }
 0x1a9   :  { %v4518_v10 = vadd.f32 %v1898_v20, %v1630_v49  ;;  %v1662_v57 = vpop.f32.mrf.mxu0 }
 0x1aa   :  { %v1900_v3 = vpop.f32.mrf.mxu1  ;;  %v1663_v49 = vadd.f32 %v1662_v57, %v1476_v17 }
 0x1ab   :  { %v4520_v23 = vadd.f32 %v1900_v3, %v1632_v29  ;;  %v1664_v33 = vpop.f32.mrf.mxu0  ;;  %v1481_v29 = vpop.permute.xlu0 %1480 }
 0x1ac   :  { %v1905_v13 = vpop.f32.mrf.mxu1 }
 0x1ad   :  { %v4522_v43 = vadd.f32 %v1905_v13, %v1641_v59  ;;  %v1673_v24 = vpop.f32.mrf.mxu0  ;;  %v1665_v59 = vadd.f32 %v1664_v33, %v1476_v17 }
 0x1ae   :  { %v1907_v9 = vpop.f32.mrf.mxu1  ;;  %v1674_v13 = vadd.f32 %v1673_v24, %v1481_v29 }
 0x1af   :  { %v4524_v12 = vadd.f32 %v1907_v9, %v1643_v27  ;;  %v1675_v51 = vpop.f32.mrf.mxu0  ;;  %v1486_v9 = vpop.permute.xlu1 %1485 }
 0x1b0   :  { %v1912_v16 = vpop.f32.mrf.mxu1 }
 0x1b1   :  { %v4526_v19 = vadd.f32 %v1912_v16, %v1652_v26  ;;  %v1684_v41 = vpop.f32.mrf.mxu0  ;;  %v1676_v26 = vadd.f32 %v1675_v51, %v1481_v29 }
 0x1b2   :  { %v1914_v20 = vpop.f32.mrf.mxu1  ;;  %v1685_v16 = vadd.f32 %v1684_v41, %v1486_v9 }
 0x1b3   :  { %v4528_v3 = vadd.f32 %v1914_v20, %v1654_v44  ;;  %v1686_v18 = vpop.f32.mrf.mxu0  ;;  %v1491_v20 = vpop.permute.xlu0 %1490 }
 0x1b4   :  { %v1919_v15 = vpop.f32.mrf.mxu1 }
 0x1b5   :  { %v4530_v47 = vadd.f32 %v1919_v15, %v1663_v49  ;;  %v1695_v7 = vpop.f32.mrf.mxu0  ;;  %v1687_v49 = vadd.f32 %v1686_v18, %v1486_v9 }
 0x1b6   :  { %v1921_v27 = vpop.f32.mrf.mxu1  ;;  %v1696_v15 = vadd.f32 %v1695_v7, %v1491_v20 }
 0x1b7   :  { %v4532_v56 = vadd.f32 %v1921_v27, %v1665_v59  ;;  %v1697_v40 = vpop.f32.mrf.mxu0  ;;  %v1496_v27 = vpop.permute.xlu1 %1495 }
 0x1b8   :  { %v1926_v54 = vpop.f32.mrf.mxu1 }
 0x1b9   :  { %v4534_v57 = vadd.f32 %v1926_v54, %v1674_v13  ;;  %v1706_v30 = vpop.f32.mrf.mxu0  ;;  %v1698_v13 = vadd.f32 %v1697_v40, %v1491_v20 }
 0x1ba   :  { %v1928_v44 = vpop.f32.mrf.mxu1  ;;  %v1707_v54 = vadd.f32 %v1706_v30, %v1496_v27 }
 0x1bb   :  { %v4536_v55 = vadd.f32 %v1928_v44, %v1676_v26  ;;  %v1708_v33 = vpop.f32.mrf.mxu0  ;;  %v1501_v44 = vpop.permute.xlu0 %1500 }
 0x1bc   :  { %v1933_v17 = vpop.f32.mrf.mxu1 }
 0x1bd   :  { %v4538_v24 = vadd.f32 %v1933_v17, %v1685_v16  ;;  %v1717_v39 = vpop.f32.mrf.mxu0  ;;  %v1709_v16 = vadd.f32 %v1708_v33, %v1496_v27 }
 0x1be   :  { %v1935_v59 = vpop.f32.mrf.mxu1  ;;  %v1718_v17 = vadd.f32 %v1717_v39, %v1501_v44 }
 0x1bf   :  { %v4540_v45 = vadd.f32 %v1935_v59, %v1687_v49  ;;  %v1719_v51 = vpop.f32.mrf.mxu0  ;;  %v1506_v59 = vpop.permute.xlu1 %1505 }
 0x1c0   :  { %v1940_v29 = vpop.f32.mrf.mxu1 }
 0x1c1   :  { %v4542_v41 = vadd.f32 %v1940_v29, %v1696_v15  ;;  %v1728_v58 = vpop.f32.mrf.mxu0  ;;  %v1720_v15 = vadd.f32 %v1719_v51, %v1501_v44 }
 0x1c2   :  { %v1942_v26 = vpop.f32.mrf.mxu1  ;;  %v1729_v29 = vadd.f32 %v1728_v58, %v1506_v59 }
 0x1c3   :  { %v4544_v28 = vadd.f32 %v1942_v26, %v1698_v13  ;;  %v1730_v18 = vpop.f32.mrf.mxu0  ;;  %v1511_v26 = vpop.permute.xlu0 %1510 }
 0x1c4   :  { %v1947_v9 = vpop.f32.mrf.mxu1 }
 0x1c5   :  { %v4546_v7 = vadd.f32 %v1947_v9, %v1707_v54  ;;  %v1739_v53 = vpop.f32.mrf.mxu0  ;;  %v1731_v54 = vadd.f32 %v1730_v18, %v1506_v59 }
 0x1c6   :  { %v1949_v49 = vpop.f32.mrf.mxu1  ;;  %v1740_v9 = vadd.f32 %v1739_v53, %v1511_v26 }
 0x1c7   :  { %v4548_v37 = vadd.f32 %v1949_v49, %v1709_v16  ;;  %v1741_v40 = vpop.f32.mrf.mxu0  ;;  %v1516_v49 = vpop.permute.xlu1 %1515 }
 0x1c8   :  { %v1954_v20 = vpop.f32.mrf.mxu1 }
 0x1c9   :  { %v4550_v30 = vadd.f32 %v1954_v20, %v1718_v17  ;;  %v1750_v25 = vpop.f32.mrf.mxu0  ;;  %v1742_v17 = vadd.f32 %v1741_v40, %v1511_v26 }
 0x1ca   :  { %v1956_v13 = vpop.f32.mrf.mxu1  ;;  %v1751_v20 = vadd.f32 %v1750_v25, %v1516_v49 }
 0x1cb   :  { %v4552_v60 = vadd.f32 %v1956_v13, %v1720_v15  ;;  %v1752_v33 = vpop.f32.mrf.mxu0  ;;  %v1521_v13 = vpop.permute.xlu0 %1520 }
 0x1cc   :  { %v1961_v27 = vpop.f32.mrf.mxu1  ;;  %v1526_v22 = vpop.permute.xlu1 %1525 }
 0x1cd   :  { %v4554_v39 = vadd.f32 %v1961_v27, %v1729_v29  ;;  %v1761_v21 = vpop.f32.mrf.mxu0  ;;  %v1753_v29 = vadd.f32 %v1752_v33, %v1516_v49 }
 0x1ce   :  { %v1963_v16 = vpop.f32.mrf.mxu1  ;;  %v1762_v27 = vadd.f32 %v1761_v21, %v1521_v13 }
 0x1cf   :  { %v4556_v46 = vadd.f32 %v1963_v16, %v1731_v54  ;;  %v1763_v51 = vpop.f32.mrf.mxu0 }
 0x1d0   :  { %v1968_v44 = vpop.f32.mrf.mxu1 }
 0x1d1   :  { %v4558_v58 = vadd.f32 %v1968_v44, %v1740_v9  ;;  %v1772_v14 = vpop.f32.mrf.mxu0  ;;  %v1764_v44 = vadd.f32 %v1763_v51, %v1521_v13 }
 0x1d2   :  { %v1970_v15 = vpop.f32.mrf.mxu1 }
 0x1d3   :  { %v4560_v34 = vadd.f32 %v1970_v15, %v1742_v17  ;;  %v1774_v18 = vpop.f32.mrf.mxu0  ;;  %v1773_v15 = vadd.f32 %v1772_v14, %v1526_v22 }
 0x1d4   :  { %v1975_v59 = vpop.f32.mrf.mxu1 }
 0x1d5   :  { %v4562_v53 = vadd.f32 %v1975_v59, %v1751_v20  ;;  %v2078_v42 = vpop.f32.mrf.mxu0 }
 0x1d6   :  { %v1977_v54 = vpop.f32.mrf.mxu1  ;;  %v2079_v16 = vadd.f32 %v2078_v42, %v4510_v35  ;;  %v1775_v35 = vadd.f32 %v1774_v18, %v1526_v22 }
 0x1d7   :  { %v4565_v40 = vadd.f32 %v1977_v54, %v1753_v29  ;;  %v2080_v26 = vpop.f32.mrf.mxu0 }
 0x1d8   :  { %v1982_v25 = vpop.f32.mrf.mxu1  ;;  %v2081_v9 = vadd.f32 %v2080_v26, %v4512_v50 }
 0x1d9   :  { %v4568_v17 = vadd.f32 %v1982_v25, %v1762_v27  ;;  %v2086_v1 = vpop.f32.mrf.mxu0 }
 0x1da   :  { %v1984_v33 = vpop.f32.mrf.mxu1  ;;  %v2087_v49 = vadd.f32 %v2086_v1, %v4514_v8 }
 0x1db   :  { %v4571_v21 = vadd.f32 %v1984_v33, %v1764_v44  ;;  %v2088_v20 = vpop.f32.mrf.mxu0 }
 0x1dc   :  { %v1989_v59 = vpop.f32.mrf.mxu1  ;;  %v2089_v42 = vadd.f32 %v2088_v20, %v4516_v36 }
 0x1dd   :  { %v4574_v29 = vadd.f32 %v1989_v59, %v1773_v15  ;;  %v2094_v54 = vpop.f32.mrf.mxu0 }
 0x1de   :  { %v1991_v0 = vpop.f32.mrf.mxu1  ;;  %v2095_v50 = vadd.f32 %v2094_v54, %v4518_v10 }
 0x1df   :  { %4996 = vst [vmem:[#allocation24_spill] sm:$0xff] %v4574_v29  ;;  %v4577_v51 = vadd.f32 %v1991_v0, %v1775_v35  ;;  %v2096_v14 = vpop.f32.mrf.mxu0 }
 0x1e0   :  { %v2280_v13 = vpop.f32.mrf.mxu1  ;;  %v2097_v27 = vadd.f32 %v2096_v14, %v4520_v23 }
 0x1e1   :  { %4997 = vst [vmem:[#allocation31_spill] sm:$0xff] %v4577_v51  ;;  %v4580_v1 = vadd.f32 %v2280_v13, %v2079_v16  ;;  %v2102_v8 = vpop.f32.mrf.mxu0 }
 0x1e2   :  { %v2282_v26 = vpop.f32.mrf.mxu1  ;;  %v2103_v25 = vadd.f32 %v2102_v8, %v4522_v43 }
 0x1e3   :  { %v4583_v36 = vadd.f32 %v2282_v26, %v2081_v9  ;;  %v2104_v22 = vpop.f32.mrf.mxu0 }
 0x1e4   :  { %v2289_v18 = vpop.f32.mrf.mxu1  ;;  %v2105_v44 = vadd.f32 %v2104_v22, %v4524_v12 }
 0x1e5   :  { %v4586_v15 = vadd.f32 %v2289_v18, %v2087_v49  ;;  %v2110_v0 = vpop.f32.mrf.mxu0 }
 0x1e6   :  { %v2291_v10 = vpop.f32.mrf.mxu1  ;;  %v2111_v33 = vadd.f32 %v2110_v0, %v4526_v19 }
 0x1e7   :  { %v4589_v20 = vadd.f32 %v2291_v10, %v2089_v42  ;;  %v2112_v23 = vpop.f32.mrf.mxu0 }
 0x1e8   :  { %v2298_v16 = vpop.f32.mrf.mxu1  ;;  %v2113_v59 = vadd.f32 %v2112_v23, %v4528_v3 }
 0x1e9   :  { %v4592_v35 = vadd.f32 %v2298_v16, %v2095_v50  ;;  %v2118_v43 = vpop.f32.mrf.mxu0 }
 0x1ea   :  { %v2300_v9 = vpop.f32.mrf.mxu1  ;;  %v2119_v54 = vadd.f32 %v2118_v43, %v4530_v47 }
 0x1eb   :  { %v4595_v14 = vadd.f32 %v2300_v9, %v2097_v27  ;;  %v2120_v12 = vpop.f32.mrf.mxu0 }
 0x1ec   :  { %v2307_v49 = vpop.f32.mrf.mxu1  ;;  %v2121_v13 = vadd.f32 %v2120_v12, %v4532_v56 }
 0x1ed   :  { %v4598_v8 = vadd.f32 %v2307_v49, %v2103_v25  ;;  %v2126_v19 = vpop.f32.mrf.mxu0 }
 0x1ee   :  { %v2309_v42 = vpop.f32.mrf.mxu1  ;;  %v2127_v26 = vadd.f32 %v2126_v19, %v4534_v57 }
 0x1ef   :  { %v4601_v22 = vadd.f32 %v2309_v42, %v2105_v44  ;;  %v2128_v3 = vpop.f32.mrf.mxu0 }
 0x1f0   :  { %v2316_v50 = vpop.f32.mrf.mxu1  ;;  %v2129_v18 = vadd.f32 %v2128_v3, %v4536_v55 }
 0x1f1   :  { %v4604_v0 = vadd.f32 %v2316_v50, %v2111_v33  ;;  %v2134_v47 = vpop.f32.mrf.mxu0 }
 0x1f2   :  { %v2318_v27 = vpop.f32.mrf.mxu1  ;;  %v2135_v10 = vadd.f32 %v2134_v47, %v4538_v24 }
 0x1f3   :  { %v4607_v23 = vadd.f32 %v2318_v27, %v2113_v59  ;;  %v2136_v56 = vpop.f32.mrf.mxu0 }
 0x1f4   :  { %v2325_v25 = vpop.f32.mrf.mxu1  ;;  %v2137_v16 = vadd.f32 %v2136_v56, %v4540_v45 }
 0x1f5   :  { %v4610_v43 = vadd.f32 %v2325_v25, %v2119_v54  ;;  %v2142_v57 = vpop.f32.mrf.mxu0 }
 0x1f6   :  { %v2327_v44 = vpop.f32.mrf.mxu1  ;;  %v2143_v9 = vadd.f32 %v2142_v57, %v4542_v41 }
 0x1f7   :  { %v4613_v12 = vadd.f32 %v2327_v44, %v2121_v13  ;;  %v2144_v55 = vpop.f32.mrf.mxu0 }
 0x1f8   :  { %v2334_v33 = vpop.f32.mrf.mxu1  ;;  %v2145_v49 = vadd.f32 %v2144_v55, %v4544_v28 }
 0x1f9   :  { %v4616_v19 = vadd.f32 %v2334_v33, %v2127_v26  ;;  %v2150_v24 = vpop.f32.mrf.mxu0 }
 0x1fa   :  { %v2336_v59 = vpop.f32.mrf.mxu1  ;;  %v2151_v42 = vadd.f32 %v2150_v24, %v4546_v7 }
 0x1fb   :  { %v4619_v3 = vadd.f32 %v2336_v59, %v2129_v18  ;;  %v2152_v45 = vpop.f32.mrf.mxu0 }
 0x1fc   :  { %v2343_v54 = vpop.f32.mrf.mxu1  ;;  %v2153_v50 = vadd.f32 %v2152_v45, %v4548_v37 }
 0x1fd   :  { %v4622_v47 = vadd.f32 %v2343_v54, %v2135_v10  ;;  %v2158_v41 = vpop.f32.mrf.mxu0 }
 0x1fe   :  { %v2345_v13 = vpop.f32.mrf.mxu1  ;;  %v2159_v27 = vadd.f32 %v2158_v41, %v4550_v30 }
 0x1ff   :  { %v4625_v56 = vadd.f32 %v2345_v13, %v2137_v16  ;;  %v2160_v28 = vpop.f32.mrf.mxu0 }
 0x200   :  { %v2352_v26 = vpop.f32.mrf.mxu1  ;;  %v2161_v25 = vadd.f32 %v2160_v28, %v4552_v60 }
 0x201   :  { %v4628_v57 = vadd.f32 %v2352_v26, %v2143_v9  ;;  %v2166_v7 = vpop.f32.mrf.mxu0 }
 0x202   :  { %v2354_v18 = vpop.f32.mrf.mxu1  ;;  %v2167_v44 = vadd.f32 %v2166_v7, %v4554_v39 }
 0x203   :  { %v4631_v55 = vadd.f32 %v2354_v18, %v2145_v49  ;;  %v2168_v37 = vpop.f32.mrf.mxu0 }
 0x204   :  { %v2361_v10 = vpop.f32.mrf.mxu1  ;;  %v2169_v33 = vadd.f32 %v2168_v37, %v4556_v46 }
 0x205   :  { %v4634_v24 = vadd.f32 %v2361_v10, %v2151_v42  ;;  %v2174_v30 = vpop.f32.mrf.mxu0 }
 0x206   :  { %v2363_v16 = vpop.f32.mrf.mxu1  ;;  %v2175_v59 = vadd.f32 %v2174_v30, %v4558_v58 }
 0x207   :  { %v4637_v45 = vadd.f32 %v2363_v16, %v2153_v50  ;;  %v2176_v60 = vpop.f32.mrf.mxu0 }
 0x208   :  { %v2370_v9 = vpop.f32.mrf.mxu1  ;;  %v2177_v54 = vadd.f32 %v2176_v60, %v4560_v34 }
 0x209   :  { %v4640_v41 = vadd.f32 %v2370_v9, %v2159_v27  ;;  %v2182_v39 = vpop.f32.mrf.mxu0 }
 0x20a   :  { %v2372_v49 = vpop.f32.mrf.mxu1  ;;  %v2183_v13 = vadd.f32 %v2182_v39, %v4562_v53 }
 0x20b   :  { %v4643_v28 = vadd.f32 %v2372_v49, %v2161_v25  ;;  %v2184_v46 = vpop.f32.mrf.mxu0 }
 0x20c   :  { %v2379_v42 = vpop.f32.mrf.mxu1  ;;  %v2185_v26 = vadd.f32 %v2184_v46, %v4565_v40 }
 0x20d   :  { %v4646_v7 = vadd.f32 %v2379_v42, %v2167_v44  ;;  %v2190_v58 = vpop.f32.mrf.mxu0 }
 0x20e   :  { %v2381_v50 = vpop.f32.mrf.mxu1  ;;  %v2191_v18 = vadd.f32 %v2190_v58, %v4568_v17 }
 0x20f   :  { %v4649_v37 = vadd.f32 %v2381_v50, %v2169_v33  ;;  %v4651_v34 = vpop.f32.mrf.mxu0 }
 0x210   :  { %v2388_v27 = vpop.f32.mrf.mxu1 }
 0x211   :  { %v4653_v10 = vadd.f32 %v2388_v27, %v2175_v59  ;;  %v4655_v53 = vpop.f32.mrf.mxu0 }
 0x212   :  { %4998 = vst [vmem:[#allocation29_spill] sm:$0xff] %v4655_v53  ;;  %v2390_v25 = vpop.f32.mrf.mxu1 }
 0x213   :  { %v4657_v30 = vadd.f32 %v2390_v25, %v2177_v54  ;;  %v4659_v16 = vpop.f32.mrf.mxu0 }
 0x214   :  { %4999 = vst [vmem:[#allocation36_spill] sm:$0xff] %v4659_v16  ;;  %v2397_v40 = vpop.f32.mrf.mxu1 }
 0x215   :  { %v4661_v44 = vadd.f32 %v2397_v40, %v2183_v13  ;;  %v2511_v60 = vpop.f32.mrf.mxu0 }
 0x216   :  { %v2399_v9 = vpop.f32.mrf.mxu1  ;;  %v2512_v13 = vadd.f32 %v2511_v60, %v4580_v1 }
 0x217   :  { %v4663_v17 = vadd.f32 %v2399_v9, %v2185_v26  ;;  %v2513_v33 = vpop.f32.mrf.mxu0 }
 0x218   :  { %v2406_v39 = vpop.f32.mrf.mxu1  ;;  %v2514_v26 = vadd.f32 %v2513_v33, %v4583_v36 }
 0x219   :  { %v4665_v49 = vadd.f32 %v2406_v39, %v2191_v18  ;;  %v2518_v59 = vpop.f32.mrf.mxu0 }
 0x21a   :  { %v4667_v46 = vpop.f32.mrf.mxu1  ;;  %v2519_v18 = vadd.f32 %v2518_v59, %v4586_v15 }
 0x21b   :  { %5000 = vst [vmem:[#allocation30_spill] sm:$0xff] %v4665_v49  ;;  %5001 = vst [vmem:[#allocation41_spill] sm:$0xff] %v4667_v46  ;;  %v2520_v42 = vpop.f32.mrf.mxu0 }
 0x21c   :  { %v4669_v58 = vpop.f32.mrf.mxu1 }
 0x21d   :  { %5002 = vst [vmem:[#allocation21_spill] sm:$0xff] %v4669_v58  ;;  %v2525_v54 = vpop.f32.mrf.mxu0  ;;  %v2521_v58 = vadd.f32 %v2520_v42, %v4589_v20 }
 0x21e   :  { %v4671_v50 = vpop.f32.mrf.mxu1  ;;  %v2526_v29 = vadd.f32 %v2525_v54, %v4592_v35 }
 0x21f   :  { %5003 = vst [vmem:[#allocation35_spill] sm:$0xff] %v4671_v50  ;;  %v2527_v27 = vpop.f32.mrf.mxu0 }
 0x220   :  { %v2696_v25 = vpop.f32.mrf.mxu1  ;;  %v2528_v15 = vadd.f32 %v2527_v27, %v4595_v14 }
 0x221   :  { %v2697_v40 = vadd.f32 %v2696_v25, %v2512_v13  ;;  %v2532_v9 = vpop.f32.mrf.mxu0 }
 0x222   :  { %v2698_v16 = vpop.f32.mrf.mxu1 }
 0x223   :  { %v2806_v39 = vsub.f32 %v2697_v40, %v4365_v62  ;;  %v2699_v51 = vadd.f32 %v2698_v16, %v2514_v26  ;;  %v2534_v49 = vpop.f32.mrf.mxu0 }
 0x224   :  { %v2703_v46 = vpop.f32.mrf.mxu1 }
 0x225   :  { %v2807_v50 = vsub.f32 %v2699_v51, %v4371_v32  ;;  %v2704_v53 = vadd.f32 %v2703_v46, %v2519_v18  ;;  %v2539_v1 = vpop.f32.mrf.mxu0  ;;  %v2838_v62 = vmul.f32 %v2806_v39, %v2806_v39  ;;  %v2533_v32 = vadd.f32 %v2532_v9, %v4598_v8 }
 0x226   :  { %v2705_v60 = vpop.f32.mrf.mxu1 }
 0x227   :  { %v2808_v36 = vsub.f32 %v2704_v53, %v4375_v61  ;;  %v2706_v33 = vadd.f32 %v2705_v60, %v2521_v58  ;;  %v2541_v13 = vpop.f32.mrf.mxu0  ;;  %v2839_v42 = vmul.f32 %v2807_v50, %v2807_v50  ;;  %v2535_v58 = vadd.f32 %v2534_v49, %v4601_v22 }
 0x228   :  { %v2710_v59 = vpop.f32.mrf.mxu1  ;;  %v2540_v50 = vadd.f32 %v2539_v1, %v4604_v0 }
 0x229   :  { %v2840_v16 = vmul.f32 %v2808_v36, %v2808_v36  ;;  %v2809_v25 = vsub.f32 %v2706_v33, %v4381_v5  ;;  %v2711_v26 = vadd.f32 %v2710_v59, %v2526_v29  ;;  %v2546_v20 = vpop.f32.mrf.mxu0  ;;  %v2542_v33 = vadd.f32 %v2541_v13, %v4607_v23 }
 0x22a   :  { %v2712_v51 = vpop.f32.mrf.mxu1 }
 0x22b   :  { %v2870_v46 = vadd.f32 %v2840_v16, %v2838_v62  ;;  %v2841_v40 = vmul.f32 %v2809_v25, %v2809_v25  ;;  %v2810_v35 = vsub.f32 %v2711_v26, %v4385_v31  ;;  %v2713_v61 = vadd.f32 %v2712_v51, %v2528_v15  ;;  %v2548_v53 = vpop.f32.mrf.mxu0 }
 0x22c   :  { %v2717_v14 = vpop.f32.mrf.mxu1  ;;  %v2547_v16 = vadd.f32 %v2546_v20, %v4610_v43 }
 0x22d   :  { %v2891_v54 = vadd.f32 %v2841_v40, %v2839_v42  ;;  %v2842_v27 = vmul.f32 %v2810_v35, %v2810_v35  ;;  %v2811_v18 = vsub.f32 %v2713_v61, %v4391_v11  ;;  %v2718_v5 = vadd.f32 %v2717_v14, %v2533_v32  ;;  %v2553_v29 = vpop.f32.mrf.mxu0 }
 0x22e   :  { %v2719_v39 = vpop.f32.mrf.mxu1  ;;  %v2549_v32 = vadd.f32 %v2548_v53, %v4613_v12  ;;  %v2554_v35 = vadd.f32 %v2553_v29, %v4616_v19 }
 0x22f   :  { %v2871_v8 = vadd.f32 %v2870_v46, %v2842_v27  ;;  %v2843_v9 = vmul.f32 %v2811_v18, %v2811_v18  ;;  %v2812_v60 = vsub.f32 %v2718_v5, %v4395_v63  ;;  %v2720_v36 = vadd.f32 %v2719_v39, %v2535_v58  ;;  %v2555_v31 = vpop.f32.mrf.mxu0 }
 0x230   :  { %v2724_v15 = vpop.f32.mrf.mxu1 }
 0x231   :  { %v2892_v22 = vadd.f32 %v2891_v54, %v2843_v9  ;;  %v2844_v49 = vmul.f32 %v2812_v60, %v2812_v60  ;;  %v2813_v59 = vsub.f32 %v2720_v36, %v4401_v38  ;;  %v2725_v62 = vadd.f32 %v2724_v15, %v2540_v50  ;;  %v2560_v11 = vpop.f32.mrf.mxu0 }
 0x232   :  { %v2726_v25 = vpop.f32.mrf.mxu1  ;;  %v2556_v54 = vadd.f32 %v2555_v31, %v4619_v3  ;;  %v2561_v50 = vadd.f32 %v2560_v11, %v4622_v47  ;;  %v5005_v11 = vld [vmem:[#allocation28_spill] sm:$0xff] }
 0x233   :  { %v2872_v0 = vadd.f32 %v2871_v8, %v2844_v49  ;;  %v2845_v1 = vmul.f32 %v2813_v59, %v2813_v59  ;;  %v2814_v26 = vsub.f32 %v2725_v62, %v4405_v6  ;;  %v2727_v42 = vadd.f32 %v2726_v25, %v2542_v33  ;;  %v2562_v63 = vpop.f32.mrf.mxu0  ;;  %v5004_v33 = vld [vmem:[#allocation23_spill] sm:$0xff] }
 0x234   :  { %v2731_v51 = vpop.f32.mrf.mxu1  ;;  %v2563_v60 = vadd.f32 %v2562_v63, %v4625_v56 }
 0x235   :  { %v2893_v23 = vadd.f32 %v2892_v22, %v2845_v1  ;;  %v2846_v13 = vmul.f32 %v2814_v26, %v2814_v26  ;;  %v2815_v46 = vsub.f32 %v2727_v42, %v4411_v2  ;;  %v2732_v40 = vadd.f32 %v2731_v51, %v2547_v16  ;;  %v2567_v38 = vpop.f32.mrf.mxu0  ;;  %v5006_v42 = vld [vmem:[#allocation32_spill] sm:$0xff] }
 0x236   :  { %v2733_v61 = vpop.f32.mrf.mxu1  ;;  %v2568_v49 = vadd.f32 %v2567_v38, %v4628_v57 }
 0x237   :  { %v2873_v43 = vadd.f32 %v2872_v0, %v2846_v13  ;;  %v2847_v20 = vmul.f32 %v2815_v46, %v2815_v46  ;;  %v2816_v58 = vsub.f32 %v2732_v40, %v4415_v4  ;;  %v2734_v14 = vadd.f32 %v2733_v61, %v2549_v32  ;;  %v2569_v6 = vpop.f32.mrf.mxu0  ;;  %v5007_v40 = vld [vmem:[#allocation34_spill] sm:$0xff] }
 0x238   :  { %v2738_v27 = vpop.f32.mrf.mxu1  ;;  %v2570_v0 = vadd.f32 %v2569_v6, %v4631_v55 }
 0x239   :  { %v2894_v12 = vadd.f32 %v2893_v23, %v2847_v20  ;;  %v2848_v53 = vmul.f32 %v2816_v58, %v2816_v58  ;;  %v2817_v18 = vsub.f32 %v2734_v14, %v4421_v48  ;;  %v2739_v5 = vadd.f32 %v2738_v27, %v2554_v35  ;;  %v2574_v2 = vpop.f32.mrf.mxu0  ;;  %v5008_v14 = vld [vmem:[#allocation39_spill] sm:$0xff] }
 0x23a   :  { %v2740_v39 = vpop.f32.mrf.mxu1  ;;  %v2575_v23 = vadd.f32 %v2574_v2, %v4634_v24 }
 0x23b   :  { %v2874_v19 = vadd.f32 %v2873_v43, %v2848_v53  ;;  %v2849_v29 = vmul.f32 %v2817_v18, %v2817_v18  ;;  %v2818_v8 = vsub.f32 %v2739_v5, %v4425_v52  ;;  %v2741_v9 = vadd.f32 %v2740_v39, %v2556_v54  ;;  %v2576_v4 = vpop.f32.mrf.mxu0  ;;  %v5009_v5 = vld [vmem:[#allocation43_spill] sm:$0xff] }
 0x23c   :  { %v2745_v36 = vpop.f32.mrf.mxu1  ;;  %v2577_v43 = vadd.f32 %v2576_v4, %v4637_v45 }
 0x23d   :  { %v2895_v3 = vadd.f32 %v2894_v12, %v2849_v29  ;;  %v2850_v31 = vmul.f32 %v2818_v8, %v2818_v8  ;;  %v2819_v15 = vsub.f32 %v2741_v9, %v5004_v33  ;;  %v2746_v22 = vadd.f32 %v2745_v36, %v2561_v50  ;;  %v2581_v48 = vpop.f32.mrf.mxu0  ;;  %v5010_v9 = vld [vmem:[#allocation47_spill] sm:$0xff] }
 0x23e   :  { %v2747_v59 = vpop.f32.mrf.mxu1  ;;  %v2582_v12 = vadd.f32 %v2581_v48, %v4640_v41 }
 0x23f   :  { %v2875_v47 = vadd.f32 %v2874_v19, %v2850_v31  ;;  %v2851_v62 = vmul.f32 %v2819_v15, %v2819_v15  ;;  %v2820_v16 = vsub.f32 %v2746_v22, %v5005_v11  ;;  %v2748_v25 = vadd.f32 %v2747_v59, %v2563_v60  ;;  %v2583_v52 = vpop.f32.mrf.mxu0  ;;  %v5011_v15 = vld [vmem:[#allocation50_spill] sm:$0xff]  ;;  %v5012_v11 = vld [vmem:[#allocation52_spill] sm:$0xff] }
 0x240   :  { %v2752_v1 = vpop.f32.mrf.mxu1  ;;  %v2584_v19 = vadd.f32 %v2583_v52, %v4643_v28 }
 0x241   :  { %v2896_v56 = vadd.f32 %v2895_v3, %v2851_v62  ;;  %v2852_v26 = vmul.f32 %v2820_v16, %v2820_v16  ;;  %v2821_v63 = vsub.f32 %v2748_v25, %v5006_v42  ;;  %v2753_v32 = vadd.f32 %v2752_v1, %v2568_v49  ;;  %v2588_v51 = vpop.f32.mrf.mxu0 }
 0x242   :  { %v2754_v13 = vpop.f32.mrf.mxu1  ;;  %v2589_v3 = vadd.f32 %v2588_v51, %v4646_v7 }
 0x243   :  { %v2876_v57 = vadd.f32 %v2875_v47, %v2852_v26  ;;  %v2853_v46 = vmul.f32 %v2821_v63, %v2821_v63  ;;  %v2822_v38 = vsub.f32 %v2753_v32, %v5007_v40  ;;  %v2755_v35 = vadd.f32 %v2754_v13, %v2570_v0  ;;  %v2590_v61 = vpop.f32.mrf.mxu0  ;;  %v5013_v26 = vld [vmem:[#allocation56_spill] sm:$0xff]  ;;  %v5014_v13 = vld [vmem:[#allocation9_spill] sm:$0xff] }
 0x244   :  { %v2759_v20 = vpop.f32.mrf.mxu1  ;;  %v2591_v59 = vadd.f32 %v2590_v61, %v4649_v37 }
 0x245   :  { %v2897_v55 = vadd.f32 %v2896_v56, %v2853_v46  ;;  %v2854_v58 = vmul.f32 %v2822_v38, %v2822_v38  ;;  %v2823_v6 = vsub.f32 %v2755_v35, %v5008_v14  ;;  %v2760_v54 = vadd.f32 %v2759_v20, %v2575_v23  ;;  %v2595_v27 = vpop.f32.mrf.mxu0 }
 0x246   :  { %v2761_v53 = vpop.f32.mrf.mxu1  ;;  %v2596_v0 = vadd.f32 %v2595_v27, %v4653_v10  ;;  %v5016_v27 = vld [vmem:[#allocation12_spill] sm:$0xff] }
 0x247   :  { %v2877_v24 = vadd.f32 %v2876_v57, %v2854_v58  ;;  %v2855_v18 = vmul.f32 %v2823_v6, %v2823_v6  ;;  %v2824_v2 = vsub.f32 %v2760_v54, %v5009_v5  ;;  %v2762_v50 = vadd.f32 %v2761_v53, %v2577_v43  ;;  %v2597_v39 = vpop.f32.mrf.mxu0  ;;  %v5015_v43 = vld [vmem:[#allocation19_spill] sm:$0xff] }
 0x248   :  { %v2766_v29 = vpop.f32.mrf.mxu1  ;;  %v2598_v32 = vadd.f32 %v2597_v39, %v4657_v30  ;;  %v2193_v58 = vadd.f32 %v4651_v34, %v4571_v21  ;;  %v5020_v39 = vld [vmem:[#allocation30_spill] sm:$0xff]  ;;  %v5021_v21 = vld [vmem:[#allocation17_spill] sm:$0xff] }
 0x249   :  { %v2898_v45 = vadd.f32 %v2897_v55, %v2855_v18  ;;  %v2856_v8 = vmul.f32 %v2824_v2, %v2824_v2  ;;  %v2825_v4 = vsub.f32 %v2762_v50, %v5010_v9  ;;  %v2767_v60 = vadd.f32 %v2766_v29, %v2582_v12  ;;  %v2602_v36 = vpop.f32.mrf.mxu0  ;;  %v5017_v18 = vld [vmem:[#allocation24_spill] sm:$0xff]  ;;  %v5019_v2 = vld [vmem:[#allocation41_spill] sm:$0xff]  ;;  %v5022_v9 = vld [vmem:[#allocation31_spill] sm:$0xff] }
 0x24a   :  { %v2768_v31 = vpop.f32.mrf.mxu1  ;;  %v2603_v38 = vadd.f32 %v2602_v36, %v4661_v44  ;;  %v5018_v44 = vld [vmem:[#allocation29_spill] sm:$0xff]  ;;  %v2409_v50 = vadd.f32 %v5019_v2, %v2193_v58  ;;  %v3063_v2 = vmov 1966171168  }
 0x24b   :  { %v2878_v41 = vadd.f32 %v2877_v24, %v2856_v8  ;;  %v2857_v33 = vmul.f32 %v2825_v4, %v2825_v4  ;;  %v2826_v22 = vsub.f32 %v2767_v60, %v5011_v15  ;;  %v2769_v48 = vadd.f32 %v2768_v31, %v2584_v19  ;;  %v2604_v49 = vpop.f32.mrf.mxu0  ;;  %v5023_v4 = vld [vmem:[#allocation36_spill] sm:$0xff]  ;;  %v5024_v36 = vld [vmem:[#allocation21_spill] sm:$0xff] }
 0x24c   :  { %v2773_v47 = vpop.f32.mrf.mxu1  ;;  %v2605_v30 = vadd.f32 %v2604_v49, %v4663_v17  ;;  %v2199_v5 = vadd.f32 %v5018_v44, %v5017_v18  ;;  %v2201_v60 = vadd.f32 %v5023_v4, %v5022_v9  ;;  %v5031_v4 = vld [vmem:[#allocation5_spill] sm:$0xff] }
 0x24d   :  { %v2899_v28 = vadd.f32 %v2898_v45, %v2857_v33  ;;  %v2858_v62 = vmul.f32 %v2826_v22, %v2826_v22  ;;  %v2827_v16 = vsub.f32 %v2769_v48, %v5012_v11  ;;  %v2774_v25 = vadd.f32 %v2773_v47, %v2589_v3  ;;  %v2609_v52 = vpop.f32.mrf.mxu0  ;;  %v5025_v48 = vld [vmem:[#allocation25_spill] sm:$0xff]  ;;  %v5026_v47 = vld [vmem:[#allocation35_spill] sm:$0xff] }
 0x24e   :  { %v2775_v1 = vpop.f32.mrf.mxu1  ;;  %v2610_v19 = vadd.f32 %v2609_v52, %v5020_v39  ;;  %v2416_v3 = vadd.f32 %v5024_v36, %v2199_v5  ;;  %v5027_v52 = vld [vmem:[#allocation13_spill] sm:$0xff] }
 0x24f   :  { %v2879_v7 = vadd.f32 %v2878_v41, %v2858_v62  ;;  %v2859_v56 = vmul.f32 %v2827_v16, %v2827_v16  ;;  %v2828_v42 = vsub.f32 %v2774_v25, %v5013_v26  ;;  %v2776_v63 = vadd.f32 %v2775_v1, %v2591_v59  ;;  %v2611_v40 = vpop.f32.mrf.mxu0 }
 0x250   :  { %v2780_v51 = vpop.f32.mrf.mxu1  ;;  %v2612_v31 = vadd.f32 %v2611_v40, %v2409_v50  ;;  %v2930_v50 = vunpack.c.l.s4 %v3063_v2 }
 0x251   :  { %v2900_v23 = vadd.f32 %v2899_v28, %v2859_v56  ;;  %v2860_v37 = vmul.f32 %v2828_v42, %v2828_v42  ;;  %v2829_v57 = vsub.f32 %v2776_v63, %v5014_v13  ;;  %v2781_v46 = vadd.f32 %v2780_v51, %v2596_v0  ;;  %v2616_v53 = vpop.f32.mrf.mxu0  ;;  %v5028_v63 = vld [vmem:[#allocation18_spill] sm:$0xff] }
 0x252   :  { %v2782_v35 = vpop.f32.mrf.mxu1  ;;  %v2418_v28 = vadd.f32 %v5026_v47, %v2201_v60  ;;  %v2617_v62 = vadd.f32 %v2616_v53, %v2416_v3 }
 0x253   :  { %v2880_v61 = vadd.f32 %v2879_v7, %v2860_v37  ;;  %v2861_v10 = vmul.f32 %v2829_v57, %v2829_v57  ;;  %v2830_v20 = vsub.f32 %v2781_v46, %v5015_v43  ;;  %v2783_v55 = vadd.f32 %v2782_v35, %v2598_v32  ;;  %v2618_v22 = vpop.f32.mrf.mxu0  ;;  %v5029_v57 = vld [vmem:[#allocation26_spill] sm:$0xff] }
 0x254   :  { %v2787_v14 = vpop.f32.mrf.mxu1  ;;  %v2619_v7 = vadd.f32 %v2618_v22, %v2418_v28 }
 0x255   :  { %v2901_v6 = vadd.f32 %v2900_v23, %v2861_v10  ;;  %v2862_v54 = vmul.f32 %v2830_v20, %v2830_v20  ;;  %v2831_v12 = vsub.f32 %v2783_v55, %v5016_v27  ;;  %v2788_v24 = vadd.f32 %v2787_v14, %v2603_v38 }
 0x256   :  { %v2789_v29 = vpop.f32.mrf.mxu1 }
 0x257   :  { %v2881_v45 = vadd.f32 %v2880_v61, %v2862_v54  ;;  %v2863_v8 = vmul.f32 %v2831_v12, %v2831_v12  ;;  %v2832_v34 = vsub.f32 %v2788_v24, %v5021_v21  ;;  %v2790_v17 = vadd.f32 %v2789_v29, %v2605_v30  ;;  %v5030_v61 = vld [vmem:[#allocation14_spill] sm:$0xff] }
 0x258   :  { %v2794_v41 = vpop.f32.mrf.mxu1  ;;  %v2931_v29 = vunpack.c.0.s8 %v2930_v50 }
 0x259   :  { %v2902_v33 = vadd.f32 %v2901_v6, %v2863_v8  ;;  %v2864_v15 = vmul.f32 %v2832_v34, %v2832_v34  ;;  %v2833_v49 = vsub.f32 %v2790_v17, %v5025_v48  ;;  %v2795_v59 = vadd.f32 %v2794_v41, %v2610_v19 }
 0x25a   :  { %v2796_v11 = vpop.f32.mrf.mxu1  ;;  %v2934_v60 = vsub.s32 %v2931_v29, %v5031_v4 }
 0x25b   :  { %v2882_v16 = vadd.f32 %v2881_v45, %v2864_v15  ;;  %v2865_v25 = vmul.f32 %v2833_v49, %v2833_v49  ;;  %v2834_v0 = vsub.f32 %v2795_v59, %v5027_v52  ;;  %v2797_v1 = vadd.f32 %v2796_v11, %v2612_v31 }
 0x25c   :  { %v2801_v56 = vpop.f32.mrf.mxu1 }
 0x25d   :  { %v2903_v26 = vadd.f32 %v2902_v33, %v2865_v25  ;;  %v2866_v42 = vmul.f32 %v2834_v0, %v2834_v0  ;;  %v2835_v32 = vsub.f32 %v2797_v1, %v5028_v63  ;;  %v2802_v51 = vadd.f32 %v2801_v56, %v2617_v62 }
 0x25e   :  { %v2803_v23 = vpop.f32.mrf.mxu1  ;;  %v5032_v33 = vlaneseq }
 0x25f   :  { %v2883_v37 = vadd.f32 %v2882_v16, %v2866_v42  ;;  %v2867_v13 = vmul.f32 %v2835_v32, %v2835_v32  ;;  %v2836_v46 = vsub.f32 %v2802_v51, %v5029_v57  ;;  %v2804_v40 = vadd.f32 %v2803_v23, %v2619_v7 }
 0x260   :  { %vm2946_vm5 = vcmp.lt.s32.totalorder %v5032_v33, 256 }
 0x261   :  { %v2904_v38 = vadd.f32 %v2903_v26, %v2867_v13  ;;  %v2868_v35 = vmul.f32 %v2836_v46, %v2836_v46  ;;  %v2837_v10 = vsub.f32 %v2804_v40, %v5030_v61 }
 0x263   :  { %v2884_v43 = vadd.f32 %v2883_v37, %v2868_v35  ;;  %v2869_v20 = vmul.f32 %v2837_v10, %v2837_v10 }
 0x265   :  { %v2885_v55 = vrot.slane %v2884_v43, 4  ;;  %v2905_v58 = vadd.f32 %v2904_v38, %v2869_v20 }
 0x267   :  { %v2886_v30 = vadd.f32 %v2885_v55, %v2884_v43  ;;  %v2906_v14 = vrot.slane %v2905_v58, 4 }
 0x269   :  { %v2887_v6 = vrot.slane %v2886_v30, 2  ;;  %v2907_v54 = vadd.f32 %v2906_v14, %v2905_v58 }
 0x26b   :  { %v2888_v27 = vadd.f32 %v2887_v6, %v2886_v30  ;;  %v2908_v12 = vrot.slane %v2907_v54, 2 }
 0x26d   :  { %v2889_v53 = vrot.slane %v2888_v27, 1  ;;  %v2909_v24 = vadd.f32 %v2908_v12, %v2907_v54 }
 0x26f   :  { %v2890_v18 = vadd.f32 %v2889_v53, %v2888_v27  ;;  %v2910_v44 = vrot.slane %v2909_v24, 1 }
 0x271   :  { %3034 = vrsqrt.f32 %v2890_v18  ;;  %v2911_v5 = vadd.f32 %v2910_v44, %v2909_v24  ;;  %vm2914_vm1 = vcmp.eq.f32.partialorder %v2890_v18, inf  ;;  %v2917_v34 = vand.u32 2147483648, %v2890_v18 }
 0x272   :  { %vm2916_vm3 = vcmp.eq.f32.partialorder %v2890_v18, 0.0 }
 0x273   :  { %3036 = vrsqrt.f32 %v2911_v5  ;;  %vm2921_vm2 = vcmp.eq.f32.partialorder %v2911_v5, inf  ;;  %v2924_v17 = vand.u32 2147483648, %v2911_v5  ;;  %vm2923_vm4 = vcmp.eq.f32.partialorder %v2911_v5, 0.0 }
 0x27e   :  { %v3035_v39 = vpop.eup %3034 }
 0x27f   :  { %v2913_v19 = vmul.f32 %v3035_v39, %v2890_v18 }
 0x280   :  { %v3037_v45 = vpop.eup %3036 }
 0x281   :  { %v2915_v8 = vsel %vm2914_vm1, %v2890_v18, %v2913_v19  ;;  %v2920_v21 = vmul.f32 %v3037_v45, %v2911_v5 }
 0x282   :  { %v2918_v36 = vsel %vm2916_vm3, %v2917_v34, %v2915_v8 }
 0x283   :  { %v2922_v9 = vsel %vm2921_vm2, %v2911_v5, %v2920_v21 }
 0x284   :  { %v2925_v3 = vsel %vm2923_vm4, %v2924_v17, %v2922_v9 }
 0x285   :  { %v2928_v31 = vcombine.low %v2918_v36, %v2925_v3 }
 0x287   :  { %v2935_v41 = vrot.slane %v2928_v31, %v2934_v60 }
 0x289   :  { %v2942_v15 = vrot.slane %v2935_v41, %v2934_v60 }
 0x28b   :  { %2948 = vst.msk [vmem:[#allocation2] sm:$0x3] %vm2946_vm5, %v2942_v15 }
 0x28c   :  { %3049 = shalt.err (!%p3046_p4)
}
 0x28d   :  { %2958 = dma.vmem_to_hbm [thread:$0]  %s2956_s25, 32, %s4752_s4, [#allocation3]  }
 0x28e   :  { %3058 = dma.done.wait [#allocation3], 32  }
 0x28f   :  { %3059 = vsyncadd [#allocation3], 4294967264 }
 0x290   :  { %2962 = vsyncpa [#allocation3], 1 }

</bundles_post_ra>
